<compile_context>
chip_gen: v7x
topology: tpu7x:2x2x1
jax: 0.10.0
libtpu: 0.0.40
codegen_flags: <defaults>
</compile_context>

<pallas_src>
import functools

import jax
import jax.numpy as jnp
from jax.experimental import pallas as pl
from jax.experimental.pallas import tpu as pltpu

IN_DIM = 2
H_DIM = 400
OUT_DIM = 2

H_PAD = 512      # 400 -> 512: hidden activations are 4 full vregs wide (no masking)
OUT_PAD = 128    # 2 -> 128: lane-dense final matmul + unmasked output store
DEFAULT_TB = 256  # batch tile (tune per generation; >=256 keeps near roofline)


def _round_up(x, m):
    return (x + m - 1) // m * m


def generator_kernel(z_ref,
                     w1_ref, b1_ref,
                     w2_ref, b2_ref,
                     w3_ref, b3_ref,
                     w4_ref, b4_ref,
                     o_ref):
    # ---- Layer 1: contraction dim K == 2, so skip the MXU entirely. ----
    # An MXU pass would pad K to 128/256 and waste >98% of systolic cycles;
    # two VPU broadcast-FMAs per 512-wide row are essentially free.
    x0 = z_ref[:, 0:1]                                   # (TB, 1)
    x1 = z_ref[:, 1:2]                                   # (TB, 1)
    h = x0 * w1_ref[0:1, :] + x1 * w1_ref[1:2, :] + b1_ref[...]
    h = jnp.maximum(h, 0.0)

    # ---- Layers 2 & 3: 512x512 MXU matmuls with f32 accumulation. ----
    # TODO(synk): on v6e/v7x these could use bf16 weights/activations (f32 acc)
    # for 2x MXU throughput; kept f32 here for exact parity with the reference.
    h = jnp.dot(h, w2_ref[...], preferred_element_type=jnp.float32) + b2_ref[...]
    h = jnp.maximum(h, 0.0)

    h = jnp.dot(h, w3_ref[...], preferred_element_type=jnp.float32) + b3_ref[...]
    h = jnp.maximum(h, 0.0)

    # ---- Layer 4: output padded to 128 lanes -> unmasked, lane-dense store. ----
    o_ref[...] = (jnp.dot(h, w4_ref[...], preferred_element_type=jnp.float32)
                  + b4_ref[...]).astype(o_ref.dtype)


def init_params(key):
    """Deterministic init matching PyTorch nn.Linear default:
    U(-1/sqrt(fan_in), 1/sqrt(fan_in)) for both weight and bias."""
    dims = [(IN_DIM, H_DIM), (H_DIM, H_DIM), (H_DIM, H_DIM), (H_DIM, OUT_DIM)]
    params = {}
    keys = jax.random.split(key, 2 * len(dims))
    for i, (fan_in, fan_out) in enumerate(dims):
        bound = 1.0 / jnp.sqrt(jnp.float32(fan_in))
        w = jax.random.uniform(keys[2 * i], (fan_in, fan_out),
                               minval=-bound, maxval=bound, dtype=jnp.float32)
        b = jax.random.uniform(keys[2 * i + 1], (1, fan_out),
                               minval=-bound, maxval=bound, dtype=jnp.float32)
        params[f"w{i + 1}"] = w
        params[f"b{i + 1}"] = b
    return params


def pad_params(params):
    """Zero-pad weights/biases to TPU-friendly shapes.

    Math stays exact: padded hidden units see 0 input + 0 bias -> ReLU(0) = 0,
    and padded output columns are identically 0 (sliced off in the wrapper)."""
    w1 = jnp.zeros((IN_DIM, H_PAD), jnp.float32).at[:, :H_DIM].set(params["w1"])
    b1 = jnp.zeros((1, H_PAD), jnp.float32).at[:, :H_DIM].set(params["b1"])
    w2 = jnp.zeros((H_PAD, H_PAD), jnp.float32).at[:H_DIM, :H_DIM].set(params["w2"])
    b2 = jnp.zeros((1, H_PAD), jnp.float32).at[:, :H_DIM].set(params["b2"])
    w3 = jnp.zeros((H_PAD, H_PAD), jnp.float32).at[:H_DIM, :H_DIM].set(params["w3"])
    b3 = jnp.zeros((1, H_PAD), jnp.float32).at[:, :H_DIM].set(params["b3"])
    w4 = jnp.zeros((H_PAD, OUT_PAD), jnp.float32).at[:H_DIM, :OUT_DIM].set(params["w4"])
    b4 = jnp.zeros((1, OUT_PAD), jnp.float32).at[:, :OUT_DIM].set(params["b4"])
    return (w1, b1, w2, b2, w3, b3, w4, b4)


@functools.partial(jax.jit, static_argnames=("tb",))
def generator_forward(z, padded_params, tb=DEFAULT_TB):
    """Fused Generator MLP as one Pallas call, tiled over the batch.

    z: (B, 2) float32
    padded_params: tuple from pad_params()
    returns: (B, 2) float32
    """
    B = z.shape[0]
    tb = min(tb, _round_up(B, 8))           # small batches: single small tile
    b_pad = _round_up(B, tb)
    z_p = jnp.pad(z, ((0, b_pad - B), (0, 0))) if b_pad != B else z

    w1, b1, w2, b2, w3, b3, w4, b4 = padded_params
    n_tiles = b_pad // tb

    # z / out are tiled over the batch grid; weights & biases use a constant
    # index_map so they stay VMEM-resident across grid iterations.
    const2d = lambda i: (0, 0)
    in_specs = [
        pl.BlockSpec((tb, IN_DIM), lambda i: (i, 0)),
        pl.BlockSpec(w1.shape, const2d), pl.BlockSpec(b1.shape, const2d),
        pl.BlockSpec(w2.shape, const2d), pl.BlockSpec(b2.shape, const2d),
        pl.BlockSpec(w3.shape, const2d), pl.BlockSpec(b3.shape, const2d),
        pl.BlockSpec(w4.shape, const2d), pl.BlockSpec(b4.shape, const2d),
    ]
    out_spec = pl.BlockSpec((tb, OUT_PAD), lambda i: (i, 0))

    flops = 2 * b_pad * (IN_DIM * H_PAD + 2 * H_PAD * H_PAD + H_PAD * OUT_PAD)
    bytes_accessed = 4 * (w1.size + b1.size + w2.size + b2.size + w3.size
                          + b3.size + w4.size + b4.size
                          + b_pad * (IN_DIM + OUT_PAD))

    out_padded = pl.pallas_call(
        generator_kernel,
        out_shape=jax.ShapeDtypeStruct((b_pad, OUT_PAD), jnp.float32),
        grid=(n_tiles,),
        in_specs=in_specs,
        out_specs=out_spec,
        compiler_params=pltpu.CompilerParams(
            dimension_semantics=("parallel",)),   # v7x: shard batch across 2 TCs
        cost_estimate=pl.CostEstimate(flops=flops, transcendentals=0,
                                      bytes_accessed=bytes_accessed),
    )(z_p, w1, b1, w2, b2, w3, b3, w4, b4)

    return out_padded[:B, :OUT_DIM]


def reference_forward(z, params):
    h = jnp.maximum(z @ params["w1"] + params["b1"], 0.0)
    h = jnp.maximum(h @ params["w2"] + params["b2"], 0.0)
    h = jnp.maximum(h @ params["w3"] + params["b3"], 0.0)
    return h @ params["w4"] + params["b4"]


if __name__ == "__main__":
    key = jax.random.PRNGKey(0)
    pkey, zkey = jax.random.split(key)

    params = init_params(pkey)
    padded_params = pad_params(params)

    batch = 8
    z = jax.random.normal(zkey, (batch, IN_DIM), dtype=jnp.float32)

    out = generator_forward(z, padded_params)
    out = jax.block_until_ready(out)

    ref = reference_forward(z, params)
    assert out.shape == (batch, OUT_DIM)
    assert jnp.allclose(out, ref, atol=1e-4, rtol=1e-4)

    print("KERNEL_OK")
</pallas_src>

<mosaic_0001>
module attributes {stable_mosaic.version = 11 : i64} {
  func.func @generator_kernel(%arg0: i32, %arg1: memref<8x2xf32, #tpu.memory_space<vmem>>, %arg2: memref<2x512xf32, #tpu.memory_space<vmem>>, %arg3: memref<1x512xf32, #tpu.memory_space<vmem>>, %arg4: memref<512x512xf32, #tpu.memory_space<vmem>>, %arg5: memref<1x512xf32, #tpu.memory_space<vmem>>, %arg6: memref<512x512xf32, #tpu.memory_space<vmem>>, %arg7: memref<1x512xf32, #tpu.memory_space<vmem>>, %arg8: memref<512x128xf32, #tpu.memory_space<vmem>>, %arg9: memref<1x128xf32, #tpu.memory_space<vmem>>, %arg10: memref<8x128xf32, #tpu.memory_space<vmem>>) attributes {dimension_semantics = [#tpu.dimension_semantics<parallel>], iteration_bounds = array<i64: 1>, scalar_prefetch = 0 : i64, scratch_operands = 0 : i64, tpu.core_type = #tpu.core_type<tc>, window_params = [{transform_indices = @transform_0, window_bounds = array<i64: 8, 2>}, {pipeline_mode = #tpu.pipeline_mode<synchronous>, transform_indices = @transform_1, window_bounds = array<i64: 2, 512>}, {pipeline_mode = #tpu.pipeline_mode<synchronous>, transform_indices = @transform_2, window_bounds = array<i64: 1, 512>}, {pipeline_mode = #tpu.pipeline_mode<synchronous>, transform_indices = @transform_3, window_bounds = array<i64: 512, 512>}, {pipeline_mode = #tpu.pipeline_mode<synchronous>, transform_indices = @transform_4, window_bounds = array<i64: 1, 512>}, {pipeline_mode = #tpu.pipeline_mode<synchronous>, transform_indices = @transform_5, window_bounds = array<i64: 512, 512>}, {pipeline_mode = #tpu.pipeline_mode<synchronous>, transform_indices = @transform_6, window_bounds = array<i64: 1, 512>}, {pipeline_mode = #tpu.pipeline_mode<synchronous>, transform_indices = @transform_7, window_bounds = array<i64: 512, 128>}, {pipeline_mode = #tpu.pipeline_mode<synchronous>, transform_indices = @transform_8, window_bounds = array<i64: 1, 128>}, {transform_indices = @transform_9, window_bounds = array<i64: 8, 128>}]} {
    %c0 = arith.constant 0 : index
    %c0_0 = arith.constant 0 : index
    %0 = vector.load %arg1[%c0, %c0_0] : memref<8x2xf32, #tpu.memory_space<vmem>>, vector<8x1xf32>
    %c0_1 = arith.constant 0 : index
    %c1 = arith.constant 1 : index
    %1 = vector.load %arg1[%c0_1, %c1] : memref<8x2xf32, #tpu.memory_space<vmem>>, vector<8x1xf32>
    %c0_2 = arith.constant 0 : index
    %c0_3 = arith.constant 0 : index
    %2 = vector.load %arg2[%c0_2, %c0_3] : memref<2x512xf32, #tpu.memory_space<vmem>>, vector<1x512xf32>
    %3 = vector.broadcast %0 : vector<8x1xf32> to vector<8x512xf32>
    %4 = vector.broadcast %2 : vector<1x512xf32> to vector<8x512xf32>
    %5 = arith.mulf %3, %4 : vector<8x512xf32>
    %c1_4 = arith.constant 1 : index
    %c0_5 = arith.constant 0 : index
    %6 = vector.load %arg2[%c1_4, %c0_5] : memref<2x512xf32, #tpu.memory_space<vmem>>, vector<1x512xf32>
    %7 = vector.broadcast %1 : vector<8x1xf32> to vector<8x512xf32>
    %8 = vector.broadcast %6 : vector<1x512xf32> to vector<8x512xf32>
    %9 = arith.mulf %7, %8 : vector<8x512xf32>
    %10 = arith.addf %5, %9 : vector<8x512xf32>
    %c0_6 = arith.constant 0 : index
    %c0_7 = arith.constant 0 : index
    %11 = vector.load %arg3[%c0_6, %c0_7] : memref<1x512xf32, #tpu.memory_space<vmem>>, vector<1x512xf32>
    %12 = vector.broadcast %11 : vector<1x512xf32> to vector<8x512xf32>
    %13 = arith.addf %10, %12 : vector<8x512xf32>
    %cst = arith.constant 0.000000e+00 : f32
    %14 = vector.broadcast %cst : f32 to vector<8x512xf32>
    %15 = arith.maximumf %13, %14 : vector<8x512xf32>
    %c0_8 = arith.constant 0 : index
    %c0_9 = arith.constant 0 : index
    %16 = vector.load %arg4[%c0_8, %c0_9] : memref<512x512xf32, #tpu.memory_space<vmem>>, vector<512x512xf32>
    %cst_10 = arith.constant dense<0.000000e+00> : vector<8x512xf32>
    %17 = tpu.matmul %15, %16, %cst_10 {dimension_numbers = #tpu.dot_dimension_numbers<[1], [0], [0], [1], [0, 0, 1, 1], [], []>} : vector<8x512xf32>, vector<512x512xf32>, vector<8x512xf32> -> vector<8x512xf32>
    %c0_11 = arith.constant 0 : index
    %c0_12 = arith.constant 0 : index
    %18 = vector.load %arg5[%c0_11, %c0_12] : memref<1x512xf32, #tpu.memory_space<vmem>>, vector<1x512xf32>
    %19 = vector.broadcast %18 : vector<1x512xf32> to vector<8x512xf32>
    %20 = arith.addf %17, %19 : vector<8x512xf32>
    %cst_13 = arith.constant 0.000000e+00 : f32
    %21 = vector.broadcast %cst_13 : f32 to vector<8x512xf32>
    %22 = arith.maximumf %20, %21 : vector<8x512xf32>
    %c0_14 = arith.constant 0 : index
    %c0_15 = arith.constant 0 : index
    %23 = vector.load %arg6[%c0_14, %c0_15] : memref<512x512xf32, #tpu.memory_space<vmem>>, vector<512x512xf32>
    %cst_16 = arith.constant dense<0.000000e+00> : vector<8x512xf32>
    %24 = tpu.matmul %22, %23, %cst_16 {dimension_numbers = #tpu.dot_dimension_numbers<[1], [0], [0], [1], [0, 0, 1, 1], [], []>} : vector<8x512xf32>, vector<512x512xf32>, vector<8x512xf32> -> vector<8x512xf32>
    %c0_17 = arith.constant 0 : index
    %c0_18 = arith.constant 0 : index
    %25 = vector.load %arg7[%c0_17, %c0_18] : memref<1x512xf32, #tpu.memory_space<vmem>>, vector<1x512xf32>
    %26 = vector.broadcast %25 : vector<1x512xf32> to vector<8x512xf32>
    %27 = arith.addf %24, %26 : vector<8x512xf32>
    %cst_19 = arith.constant 0.000000e+00 : f32
    %28 = vector.broadcast %cst_19 : f32 to vector<8x512xf32>
    %29 = arith.maximumf %27, %28 : vector<8x512xf32>
    %c0_20 = arith.constant 0 : index
    %c0_21 = arith.constant 0 : index
    %30 = vector.load %arg8[%c0_20, %c0_21] : memref<512x128xf32, #tpu.memory_space<vmem>>, vector<512x128xf32>
    %cst_22 = arith.constant dense<0.000000e+00> : vector<8x128xf32>
    %31 = tpu.matmul %29, %30, %cst_22 {dimension_numbers = #tpu.dot_dimension_numbers<[1], [0], [0], [1], [0, 0, 1, 1], [], []>} : vector<8x512xf32>, vector<512x128xf32>, vector<8x128xf32> -> vector<8x128xf32>
    %c0_23 = arith.constant 0 : index
    %c0_24 = arith.constant 0 : index
    %32 = vector.load %arg9[%c0_23, %c0_24] : memref<1x128xf32, #tpu.memory_space<vmem>>, vector<1x128xf32>
    %33 = vector.broadcast %32 : vector<1x128xf32> to vector<8x128xf32>
    %34 = arith.addf %31, %33 : vector<8x128xf32>
    %c0_25 = arith.constant 0 : index
    %c0_26 = arith.constant 0 : index
    %35 = vector.load %arg10[%c0_25, %c0_26] : memref<8x128xf32, #tpu.memory_space<vmem>>, vector<8x128xf32>
    tpu.vector_store %arg10[%c0_25, %c0_26], %34 {strides = array<i32>} : memref<8x128xf32, #tpu.memory_space<vmem>>, vector<8x128xf32>,
    return
  }
  func.func @transform_0(%arg0: i32) -> (i32, i32) {
    %c0_i32 = arith.constant 0 : i32
    %c0_i32_0 = arith.constant 0 : i32
    return %arg0, %c0_i32 : i32, i32
  }
  func.func @transform_1(%arg0: i32) -> (i32, i32) {
    %c0_i32 = arith.constant 0 : i32
    %c0_i32_0 = arith.constant 0 : i32
    %c0_i32_1 = arith.constant 0 : i32
    return %c0_i32, %c0_i32_0 : i32, i32
  }
  func.func @transform_2(%arg0: i32) -> (i32, i32) {
    %c0_i32 = arith.constant 0 : i32
    %c0_i32_0 = arith.constant 0 : i32
    %c0_i32_1 = arith.constant 0 : i32
    return %c0_i32, %c0_i32_0 : i32, i32
  }
  func.func @transform_3(%arg0: i32) -> (i32, i32) {
    %c0_i32 = arith.constant 0 : i32
    %c0_i32_0 = arith.constant 0 : i32
    %c0_i32_1 = arith.constant 0 : i32
    return %c0_i32, %c0_i32_0 : i32, i32
  }
  func.func @transform_4(%arg0: i32) -> (i32, i32) {
    %c0_i32 = arith.constant 0 : i32
    %c0_i32_0 = arith.constant 0 : i32
    %c0_i32_1 = arith.constant 0 : i32
    return %c0_i32, %c0_i32_0 : i32, i32
  }
  func.func @transform_5(%arg0: i32) -> (i32, i32) {
    %c0_i32 = arith.constant 0 : i32
    %c0_i32_0 = arith.constant 0 : i32
    %c0_i32_1 = arith.constant 0 : i32
    return %c0_i32, %c0_i32_0 : i32, i32
  }
  func.func @transform_6(%arg0: i32) -> (i32, i32) {
    %c0_i32 = arith.constant 0 : i32
    %c0_i32_0 = arith.constant 0 : i32
    %c0_i32_1 = arith.constant 0 : i32
    return %c0_i32, %c0_i32_0 : i32, i32
  }
  func.func @transform_7(%arg0: i32) -> (i32, i32) {
    %c0_i32 = arith.constant 0 : i32
    %c0_i32_0 = arith.constant 0 : i32
    %c0_i32_1 = arith.constant 0 : i32
    return %c0_i32, %c0_i32_0 : i32, i32
  }
  func.func @transform_8(%arg0: i32) -> (i32, i32) {
    %c0_i32 = arith.constant 0 : i32
    %c0_i32_0 = arith.constant 0 : i32
    %c0_i32_1 = arith.constant 0 : i32
    return %c0_i32, %c0_i32_0 : i32, i32
  }
  func.func @transform_9(%arg0: i32) -> (i32, i32) {
    %c0_i32 = arith.constant 0 : i32
    %c0_i32_0 = arith.constant 0 : i32
    return %arg0, %c0_i32 : i32, i32
  }
}

</mosaic_0001>

<bundles_post_ra>
// kernel: generator_forward.1
= control target key start
LH: loop header
LB: loop body
LE: loop exit
PB: predicated region body
PF: predicated region fallthrough
CT: control target
= control target key end

     0   :  { %14 = vsyncpa [#allocation3], 0  ;;  %s2431_s0 = inlined_call_operand.vmem [shape: f32[8,2], index: 0, kind: input, shape index: {}]   ;;  %s2432_s1 = inlined_call_operand.vmem [shape: f32[2,512], index: 1, kind: input, shape index: {}]   ;;  %s2433_s2 = inlined_call_operand.vmem [shape: f32[1,512], index: 2, kind: input, shape index: {}]   ;;  %s2434_s3 = inlined_call_operand.hbm [shape: f32[512,512], index: 3, kind: input, shape index: {}]   ;;  %s2435_s4 = inlined_call_operand.vmem [shape: f32[1,512], index: 4, kind: input, shape index: {}]   ;;  %s2436_s5 = inlined_call_operand.hbm [shape: f32[512,512], index: 5, kind: input, shape index: {}]   ;;  %s2437_s6 = inlined_call_operand.vmem [shape: f32[1,512], index: 6, kind: input, shape index: {}]   ;;  %s2438_s7 = inlined_call_operand.hbm [shape: f32[512,128], index: 7, kind: input, shape index: {}]   ;;  %s2439_s8 = inlined_call_operand.vmem [shape: f32[1,128], index: 8, kind: input, shape index: {}]   ;;  %s2440_s9 = inlined_call_operand.vmem [shape: f32[8,128], index: 9, kind: output, shape index: {}]  }
   0x1   :  { %15 = vsyncpa [#allocation5], 0  ;;  %s2265_s30 = smov [#allocation4]   ;;  %s2266_s11 = smov [#allocation2]  }
   0x2   :  { %s41_s10 = sshll.u32 %s2265_s30, 4  ;;  %s27_s12 = sshll.u32 %s2266_s11, 4  ;;  %s42_s10 = int_to_ptr.vmem [resolvable:$true] %s41_s10  ;;  %s2324_s12 = int_to_ptr.vmem [resolvable:$true] %s27_s12 }
   0x3   :  { %s2195_s15 = scalar_lea.hbm %s2436_s5, 32768 }
   0x4   :  { %p2196_p0 = scmp.ne.s32.totalorder %s2436_s5, %s2195_s15  ;;  %p2199_p1 = scmp.lt.u32.totalorder %s2195_s15, %s2436_s5 }
   0x6   :  { %p2201_p2 = pnand %p2199_p1, %p2196_p0 }
   0x8   :  { %2204 = shalt.err (!%p2201_p2)
}
   0x9   :  { %s2205_s20 = scalar_lea.vmem %s42_s10, 32768  ;;  %p2210_p4 = scmp.lt.s32.totalorder %s42_s10, %s42_s10 }
   0xa   :  { %p2206_p3 = scmp.ne.s32.totalorder %s42_s10, %s2205_s20  ;;  %p2211_p5 = scmp.lt.s32.totalorder %s2205_s20, %s2205_s20 }
   0xc   :  { %p2212_p6 = por %p2211_p5, %p2210_p4 }
   0xe   :  { %p2213_p7 = pnand %p2212_p6, %p2206_p3 }
  0x10   :  { %2216 = shalt.err (!%p2213_p7)
}
  0x11   :  { %s2267_s21 = smov 512   ;;  %s2268_s22 = smov 32  }
  0x12   :  { %47 = dma.hbm_to_vmem [thread:$0]  %s2436_s5, 32768, %s42_s10, [#allocation5], %s2267_s21, %s2267_s21, %s2268_s22  }
  0x13   :  { %s2217_s27 = scalar_lea.hbm %s2434_s3, 32768 }
  0x14   :  { %p2218_p8 = scmp.ne.s32.totalorder %s2434_s3, %s2217_s27  ;;  %p2221_p9 = scmp.lt.u32.totalorder %s2217_s27, %s2434_s3 }
  0x16   :  { %p2223_p10 = pnand %p2221_p9, %p2218_p8 }
  0x18   :  { %2226 = shalt.err (!%p2223_p10)
}
  0x19   :  { %s2227_s13 = scalar_lea.vmem %s2324_s12, 32768  ;;  %p2232_p12 = scmp.lt.s32.totalorder %s2324_s12, %s2324_s12 }
  0x1a   :  { %p2228_p11 = scmp.ne.s32.totalorder %s2324_s12, %s2227_s13  ;;  %p2233_p13 = scmp.lt.s32.totalorder %s2227_s13, %s2227_s13 }
  0x1c   :  { %p2234_p0 = por %p2233_p13, %p2232_p12 }
  0x1e   :  { %p2235_p1 = pnand %p2234_p0, %p2228_p11 }
  0x20   :  { %2238 = shalt.err (!%p2235_p1)
}
  0x21   :  { %33 = dma.hbm_to_vmem [thread:$0]  %s2434_s3, 32768, %s2324_s12, [#allocation3], %s2267_s21, %s2267_s21, %s2268_s22  }
  0x22   :  { %s2269_s14 = smov [#allocation6]   ;;  %s2239_s18 = scalar_lea.hbm %s2438_s7, 8192 }
  0x23   :  { %s55_s15 = sshll.u32 %s2269_s14, 4  ;;  %p2240_p2 = scmp.ne.s32.totalorder %s2438_s7, %s2239_s18  ;;  %s56_s15 = int_to_ptr.vmem [resolvable:$true] %s55_s15 }
  0x24   :  { %p2243_p3 = scmp.lt.u32.totalorder %s2239_s18, %s2438_s7 }
  0x26   :  { %p2245_p4 = pnand %p2243_p3, %p2240_p2 }
  0x28   :  { %2248 = shalt.err (!%p2245_p4)
}
  0x29   :  { %s2249_s25 = scalar_lea.vmem %s56_s15, 8192  ;;  %p2254_p6 = scmp.lt.s32.totalorder %s56_s15, %s56_s15 }
  0x2a   :  { %p2250_p5 = scmp.ne.s32.totalorder %s56_s15, %s2249_s25  ;;  %p2255_p7 = scmp.lt.s32.totalorder %s2249_s25, %s2249_s25 }
  0x2c   :  { %p2256_p8 = por %p2255_p7, %p2254_p6 }
  0x2e   :  { %p2257_p9 = pnand %p2256_p8, %p2250_p5 }
  0x30   :  { %2260 = shalt.err (!%p2257_p9)
}
  0x31   :  { %s2270_s3 = smov 128   ;;  %s2271_s12 = smov 8  }
  0x32   :  { %61 = dma.hbm_to_vmem [thread:$0]  %s2438_s7, 8192, %s56_s15, [#allocation5], %s2270_s3, %s2270_s3, %s2271_s12  }
  0x33   :  { %2261 = dma.done.wait [#allocation3], 32768  }
  0x34   :  { %2262 = vsyncadd [#allocation3], 4294934528 }
  0x35   :  { %2263 = dma.done.wait [#allocation5], 40960  }
  0x36   :  { %2264 = vsyncadd [#allocation5], 4294926336  ;;  %v2272_v0 = vmov 0   ;;  %v73_v1 = vld [vmem:[%s2431_s0] sm:$0xff]  ;;  %v171_v2 = vld [vmem:[#allocation2 + $0x8] sm:$0xff]  ;;  %v2273_v21 = vmov 1  }
  0x37   :  { %2193 = vset.pattern.permute.xlu0 %v2272_v0  ;;  %v175_v3 = vld [vmem:[#allocation2 + $0x28] sm:$0xff]  ;;  %v173_v5 = vld [vmem:[#allocation2 + $0x18] sm:$0xff]  ;;  %v170_v7 = vld [vmem:[#allocation2] sm:$0xff] }
  0x38   :  { %77 = vperm.xlu0 %2193, %v73_v1   ;;  %v1592_v4 = vpack.c.bf16 %v175_v3, %v171_v2  ;;  %v177_v6 = vld [vmem:[#allocation2 + $0x38] sm:$0xff]  ;;  %v174_v9 = vld [vmem:[#allocation2 + $0x20] sm:$0xff]  ;;  %v172_v10 = vld [vmem:[#allocation2 + $0x10] sm:$0xff] }
  0x39   :  { %v1720_v8 = vpack.c.bf16 %v177_v6, %v173_v5  ;;  %v176_v11 = vld [vmem:[#allocation2 + $0x30] sm:$0xff]  ;;  %v1594_v12 = vpack.c.bf16 %v174_v9, %v170_v7  ;;  %v179_v14 = vld [vmem:[#allocation2 + $0x48] sm:$0xff]  ;;  %v181_v16 = vld [vmem:[#allocation2 + $0x58] sm:$0xff] }
  0x3a   :  { %1593 = vmatprep.subr.bf16.mxu0 %v1592_v4  ;;  %v1722_v13 = vpack.c.bf16 %v176_v11, %v172_v10  ;;  %v183_v15 = vld [vmem:[#allocation2 + $0x68] sm:$0xff]  ;;  %v185_v18 = vld [vmem:[#allocation2 + $0x78] sm:$0xff]  ;;  %v178_v19 = vld [vmem:[#allocation2 + $0x40] sm:$0xff] }
  0x3b   :  { %1721 = vmatprep.subr.bf16.mxu1 %v1720_v8  ;;  %v1596_v17 = vpack.c.bf16 %v183_v15, %v179_v14  ;;  %v182_v20 = vld [vmem:[#allocation2 + $0x60] sm:$0xff]  ;;  %1595 = vmatpush1.bf16.msra.mxu0 %v1594_v12  ;;  %v1724_v22 = vpack.c.bf16 %v185_v18, %v181_v16  ;;  %v180_v24 = vld [vmem:[#allocation2 + $0x50] sm:$0xff]  ;;  %v187_v26 = vld [vmem:[#allocation2 + $0x88] sm:$0xff] }
  0x3c   :  { %2194 = vset.pattern.permute.xlu0 %v2273_v21  ;;  %v1598_v23 = vpack.c.bf16 %v182_v20, %v178_v19  ;;  %v184_v25 = vld [vmem:[#allocation2 + $0x70] sm:$0xff]  ;;  %1723 = vmatpush1.bf16.msra.mxu1 %v1722_v13  ;;  %v191_v28 = vld [vmem:[#allocation2 + $0xa8] sm:$0xff]  ;;  %v189_v29 = vld [vmem:[#allocation2 + $0x98] sm:$0xff] }
  0x3d   :  { %108 = vperm.xlu0 %2194, %v73_v1   ;;  %v1726_v27 = vpack.c.bf16 %v184_v25, %v180_v24  ;;  %v193_v30 = vld [vmem:[#allocation2 + $0xb8] sm:$0xff]  ;;  %1597 = vmatprep.subr.bf16.mxu0 %v1596_v17  ;;  %v1600_v31 = vpack.c.bf16 %v191_v28, %v187_v26  ;;  %v186_v33 = vld [vmem:[#allocation2 + $0x80] sm:$0xff]  ;;  %v188_v35 = vld [vmem:[#allocation2 + $0x90] sm:$0xff] }
  0x3e   :  { %1725 = vmatprep.subr.bf16.mxu1 %v1724_v22  ;;  %v1728_v32 = vpack.c.bf16 %v193_v30, %v189_v29  ;;  %v190_v34 = vld [vmem:[#allocation2 + $0xa0] sm:$0xff]  ;;  %v192_v36 = vld [vmem:[#allocation2 + $0xb0] sm:$0xff]  ;;  %v195_v37 = vld [vmem:[#allocation2 + $0xc8] sm:$0xff] }
  0x3f   :  { %v199_v38 = vld [vmem:[#allocation2 + $0xe8] sm:$0xff]  ;;  %1599 = vmatpush1.bf16.msra.mxu0 %v1598_v23  ;;  %v1602_v39 = vpack.c.bf16 %v190_v34, %v186_v33  ;;  %v197_v40 = vld [vmem:[#allocation2 + $0xd8] sm:$0xff]  ;;  %v1730_v42 = vpack.c.bf16 %v192_v36, %v188_v35  ;;  %v194_v44 = vld [vmem:[#allocation2 + $0xc0] sm:$0xff] }
  0x40   :  { %v201_v41 = vld [vmem:[#allocation2 + $0xf8] sm:$0xff]  ;;  %1727 = vmatpush1.bf16.msra.mxu1 %v1726_v27  ;;  %1601 = vmatprep.subr.bf16.mxu0 %v1600_v31  ;;  %v1604_v43 = vpack.c.bf16 %v199_v38, %v195_v37  ;;  %v198_v45 = vld [vmem:[#allocation2 + $0xe0] sm:$0xff]  ;;  %v196_v46 = vld [vmem:[#allocation2 + $0xd0] sm:$0xff] }
  0x41   :  { %1729 = vmatprep.subr.bf16.mxu1 %v1728_v32  ;;  %v1732_v47 = vpack.c.bf16 %v201_v41, %v197_v40  ;;  %v200_v48 = vld [vmem:[#allocation2 + $0xf0] sm:$0xff]  ;;  %v203_v49 = vld [vmem:[#allocation2 + $0x108] sm:$0xff]  ;;  %v205_v51 = vld [vmem:[#allocation2 + $0x118] sm:$0xff]  ;;  %v1606_v53 = vpack.c.bf16 %v198_v45, %v194_v44 }
  0x42   :  { %v207_v50 = vld [vmem:[#allocation2 + $0x128] sm:$0xff]  ;;  %v209_v52 = vld [vmem:[#allocation2 + $0x138] sm:$0xff]  ;;  %v1734_v54 = vpack.c.bf16 %v200_v48, %v196_v46  ;;  %v202_v56 = vld [vmem:[#allocation2 + $0x100] sm:$0xff] }
  0x43   :  { %1603 = vmatpush1.bf16.msra.mxu0 %v1602_v39  ;;  %v1608_v55 = vpack.c.bf16 %v207_v50, %v203_v49  ;;  %v206_v57 = vld [vmem:[#allocation2 + $0x120] sm:$0xff]  ;;  %v204_v58 = vld [vmem:[#allocation2 + $0x110] sm:$0xff]  ;;  %v1736_v59 = vpack.c.bf16 %v209_v52, %v205_v51  ;;  %v211_v61 = vld [vmem:[#allocation2 + $0x148] sm:$0xff] }
  0x44   :  { %1731 = vmatpush1.bf16.msra.mxu1 %v1730_v42  ;;  %1605 = vmatprep.subr.bf16.mxu0 %v1604_v43  ;;  %v208_v60 = vld [vmem:[#allocation2 + $0x130] sm:$0xff]  ;;  %v215_v62 = vld [vmem:[#allocation2 + $0x168] sm:$0xff]  ;;  %v213_v63 = vld [vmem:[#allocation2 + $0x158] sm:$0xff]  ;;  %v1610_v1 = vpack.c.bf16 %v206_v57, %v202_v56 }
  0x45   :  { %1733 = vmatprep.subr.bf16.mxu1 %v1732_v47  ;;  %v217_v0 = vld [vmem:[#allocation2 + $0x178] sm:$0xff]  ;;  %v1738_v2 = vpack.c.bf16 %v208_v60, %v204_v58  ;;  %v1612_v3 = vpack.c.bf16 %v215_v62, %v211_v61  ;;  %v210_v4 = vld [vmem:[#allocation2 + $0x140] sm:$0xff]  ;;  %v212_v6 = vld [vmem:[#allocation2 + $0x150] sm:$0xff] }
  0x46   :  { %v214_v5 = vld [vmem:[#allocation2 + $0x160] sm:$0xff]  ;;  %v1740_v7 = vpack.c.bf16 %v217_v0, %v213_v63  ;;  %v216_v8 = vld [vmem:[#allocation2 + $0x170] sm:$0xff]  ;;  %v219_v9 = vld [vmem:[#allocation2 + $0x188] sm:$0xff] }
  0x47   :  { %1607 = vmatpush1.bf16.msra.mxu0 %v1606_v53  ;;  %v223_v10 = vld [vmem:[#allocation2 + $0x1a8] sm:$0xff]  ;;  %v221_v11 = vld [vmem:[#allocation2 + $0x198] sm:$0xff]  ;;  %v1614_v13 = vpack.c.bf16 %v214_v5, %v210_v4  ;;  %v1742_v14 = vpack.c.bf16 %v216_v8, %v212_v6  ;;  %v218_v16 = vld [vmem:[#allocation2 + $0x180] sm:$0xff] }
  0x48   :  { %1735 = vmatpush1.bf16.msra.mxu1 %v1734_v54  ;;  %1609 = vmatprep.subr.bf16.mxu0 %v1608_v55  ;;  %v225_v12 = vld [vmem:[#allocation2 + $0x1b8] sm:$0xff]  ;;  %v1616_v15 = vpack.c.bf16 %v223_v10, %v219_v9  ;;  %v222_v17 = vld [vmem:[#allocation2 + $0x1a0] sm:$0xff]  ;;  %v220_v18 = vld [vmem:[#allocation2 + $0x190] sm:$0xff] }
  0x49   :  { %1737 = vmatprep.subr.bf16.mxu1 %v1736_v59  ;;  %v1744_v19 = vpack.c.bf16 %v225_v12, %v221_v11  ;;  %v224_v20 = vld [vmem:[#allocation2 + $0x1b0] sm:$0xff]  ;;  %v227_v21 = vld [vmem:[#allocation2 + $0x1c8] sm:$0xff]  ;;  %v229_v23 = vld [vmem:[#allocation2 + $0x1d8] sm:$0xff]  ;;  %v1618_v25 = vpack.c.bf16 %v222_v17, %v218_v16 }
  0x4a   :  { %v231_v22 = vld [vmem:[#allocation2 + $0x1e8] sm:$0xff]  ;;  %v233_v24 = vld [vmem:[#allocation2 + $0x1f8] sm:$0xff]  ;;  %v1746_v26 = vpack.c.bf16 %v224_v20, %v220_v18  ;;  %v226_v28 = vld [vmem:[#allocation2 + $0x1c0] sm:$0xff] }
  0x4b   :  { %1611 = vmatpush1.bf16.msra.mxu0 %v1610_v1  ;;  %v1620_v27 = vpack.c.bf16 %v231_v22, %v227_v21  ;;  %v230_v29 = vld [vmem:[#allocation2 + $0x1e0] sm:$0xff]  ;;  %v228_v30 = vld [vmem:[#allocation2 + $0x1d0] sm:$0xff]  ;;  %v1748_v31 = vpack.c.bf16 %v233_v24, %v229_v23  ;;  %v235_v33 = vld [vmem:[#allocation2 + $0x208] sm:$0xff] }
  0x4c   :  { %1739 = vmatpush1.bf16.msra.mxu1 %v1738_v2  ;;  %1613 = vmatprep.subr.bf16.mxu0 %v1612_v3  ;;  %v232_v32 = vld [vmem:[#allocation2 + $0x1f0] sm:$0xff]  ;;  %v239_v34 = vld [vmem:[#allocation2 + $0x228] sm:$0xff]  ;;  %v237_v35 = vld [vmem:[#allocation2 + $0x218] sm:$0xff]  ;;  %v1622_v37 = vpack.c.bf16 %v230_v29, %v226_v28 }
  0x4d   :  { %1741 = vmatprep.subr.bf16.mxu1 %v1740_v7  ;;  %v241_v36 = vld [vmem:[#allocation2 + $0x238] sm:$0xff]  ;;  %v1750_v38 = vpack.c.bf16 %v232_v32, %v228_v30  ;;  %v1624_v39 = vpack.c.bf16 %v239_v34, %v235_v33  ;;  %v234_v40 = vld [vmem:[#allocation2 + $0x200] sm:$0xff]  ;;  %v236_v42 = vld [vmem:[#allocation2 + $0x210] sm:$0xff] }
  0x4e   :  { %v238_v41 = vld [vmem:[#allocation2 + $0x220] sm:$0xff]  ;;  %v1752_v43 = vpack.c.bf16 %v241_v36, %v237_v35  ;;  %v240_v44 = vld [vmem:[#allocation2 + $0x230] sm:$0xff]  ;;  %v243_v45 = vld [vmem:[#allocation2 + $0x248] sm:$0xff] }
  0x4f   :  { %1615 = vmatpush1.bf16.msra.mxu0 %v1614_v13  ;;  %v247_v46 = vld [vmem:[#allocation2 + $0x268] sm:$0xff]  ;;  %v245_v47 = vld [vmem:[#allocation2 + $0x258] sm:$0xff]  ;;  %v1626_v49 = vpack.c.bf16 %v238_v41, %v234_v40  ;;  %v1754_v50 = vpack.c.bf16 %v240_v44, %v236_v42  ;;  %v242_v52 = vld [vmem:[#allocation2 + $0x240] sm:$0xff] }
  0x50   :  { %1743 = vmatpush1.bf16.msra.mxu1 %v1742_v14  ;;  %1617 = vmatprep.subr.bf16.mxu0 %v1616_v15  ;;  %v249_v48 = vld [vmem:[#allocation2 + $0x278] sm:$0xff]  ;;  %v1628_v51 = vpack.c.bf16 %v247_v46, %v243_v45  ;;  %v246_v53 = vld [vmem:[#allocation2 + $0x260] sm:$0xff]  ;;  %v244_v54 = vld [vmem:[#allocation2 + $0x250] sm:$0xff] }
  0x51   :  { %1745 = vmatprep.subr.bf16.mxu1 %v1744_v19  ;;  %v1756_v55 = vpack.c.bf16 %v249_v48, %v245_v47  ;;  %v248_v56 = vld [vmem:[#allocation2 + $0x270] sm:$0xff]  ;;  %v251_v57 = vld [vmem:[#allocation2 + $0x288] sm:$0xff]  ;;  %v253_v59 = vld [vmem:[#allocation2 + $0x298] sm:$0xff]  ;;  %v1630_v61 = vpack.c.bf16 %v246_v53, %v242_v52 }
  0x52   :  { %v255_v58 = vld [vmem:[#allocation2 + $0x2a8] sm:$0xff]  ;;  %v257_v60 = vld [vmem:[#allocation2 + $0x2b8] sm:$0xff]  ;;  %v1758_v62 = vpack.c.bf16 %v248_v56, %v244_v54  ;;  %v250_v0 = vld [vmem:[#allocation2 + $0x280] sm:$0xff] }
  0x53   :  { %1619 = vmatpush1.bf16.msra.mxu0 %v1618_v25  ;;  %v1632_v63 = vpack.c.bf16 %v255_v58, %v251_v57  ;;  %v254_v1 = vld [vmem:[#allocation2 + $0x2a0] sm:$0xff]  ;;  %v252_v2 = vld [vmem:[#allocation2 + $0x290] sm:$0xff]  ;;  %v1760_v3 = vpack.c.bf16 %v257_v60, %v253_v59  ;;  %v259_v5 = vld [vmem:[#allocation2 + $0x2c8] sm:$0xff] }
  0x54   :  { %1747 = vmatpush1.bf16.msra.mxu1 %v1746_v26  ;;  %1621 = vmatprep.subr.bf16.mxu0 %v1620_v27  ;;  %v256_v4 = vld [vmem:[#allocation2 + $0x2b0] sm:$0xff]  ;;  %v263_v6 = vld [vmem:[#allocation2 + $0x2e8] sm:$0xff]  ;;  %v261_v7 = vld [vmem:[#allocation2 + $0x2d8] sm:$0xff]  ;;  %v1634_v9 = vpack.c.bf16 %v254_v1, %v250_v0 }
  0x55   :  { %1749 = vmatprep.subr.bf16.mxu1 %v1748_v31  ;;  %v265_v8 = vld [vmem:[#allocation2 + $0x2f8] sm:$0xff]  ;;  %v1762_v10 = vpack.c.bf16 %v256_v4, %v252_v2  ;;  %v1636_v11 = vpack.c.bf16 %v263_v6, %v259_v5  ;;  %v258_v12 = vld [vmem:[#allocation2 + $0x2c0] sm:$0xff]  ;;  %v260_v14 = vld [vmem:[#allocation2 + $0x2d0] sm:$0xff] }
  0x56   :  { %v262_v13 = vld [vmem:[#allocation2 + $0x2e0] sm:$0xff]  ;;  %v1764_v15 = vpack.c.bf16 %v265_v8, %v261_v7  ;;  %v264_v16 = vld [vmem:[#allocation2 + $0x2f0] sm:$0xff]  ;;  %v267_v17 = vld [vmem:[#allocation2 + $0x308] sm:$0xff] }
  0x57   :  { %1623 = vmatpush1.bf16.msra.mxu0 %v1622_v37  ;;  %v271_v18 = vld [vmem:[#allocation2 + $0x328] sm:$0xff]  ;;  %v269_v19 = vld [vmem:[#allocation2 + $0x318] sm:$0xff]  ;;  %v1638_v21 = vpack.c.bf16 %v262_v13, %v258_v12  ;;  %v1766_v22 = vpack.c.bf16 %v264_v16, %v260_v14  ;;  %v266_v24 = vld [vmem:[#allocation2 + $0x300] sm:$0xff] }
  0x58   :  { %1751 = vmatpush1.bf16.msra.mxu1 %v1750_v38  ;;  %1625 = vmatprep.subr.bf16.mxu0 %v1624_v39  ;;  %v273_v20 = vld [vmem:[#allocation2 + $0x338] sm:$0xff]  ;;  %v1640_v23 = vpack.c.bf16 %v271_v18, %v267_v17  ;;  %v270_v25 = vld [vmem:[#allocation2 + $0x320] sm:$0xff]  ;;  %v268_v26 = vld [vmem:[#allocation2 + $0x310] sm:$0xff] }
  0x59   :  { %1753 = vmatprep.subr.bf16.mxu1 %v1752_v43  ;;  %v1768_v27 = vpack.c.bf16 %v273_v20, %v269_v19  ;;  %v272_v28 = vld [vmem:[#allocation2 + $0x330] sm:$0xff]  ;;  %v275_v29 = vld [vmem:[#allocation2 + $0x348] sm:$0xff]  ;;  %v277_v31 = vld [vmem:[#allocation2 + $0x358] sm:$0xff]  ;;  %v1642_v33 = vpack.c.bf16 %v270_v25, %v266_v24 }
  0x5a   :  { %v279_v30 = vld [vmem:[#allocation2 + $0x368] sm:$0xff]  ;;  %v281_v32 = vld [vmem:[#allocation2 + $0x378] sm:$0xff]  ;;  %v1770_v34 = vpack.c.bf16 %v272_v28, %v268_v26  ;;  %v274_v36 = vld [vmem:[#allocation2 + $0x340] sm:$0xff] }
  0x5b   :  { %1627 = vmatpush1.bf16.msra.mxu0 %v1626_v49  ;;  %v1644_v35 = vpack.c.bf16 %v279_v30, %v275_v29  ;;  %v278_v37 = vld [vmem:[#allocation2 + $0x360] sm:$0xff]  ;;  %v276_v38 = vld [vmem:[#allocation2 + $0x350] sm:$0xff]  ;;  %v1772_v39 = vpack.c.bf16 %v281_v32, %v277_v31  ;;  %v283_v41 = vld [vmem:[#allocation2 + $0x388] sm:$0xff] }
  0x5c   :  { %1755 = vmatpush1.bf16.msra.mxu1 %v1754_v50  ;;  %1629 = vmatprep.subr.bf16.mxu0 %v1628_v51  ;;  %v280_v40 = vld [vmem:[#allocation2 + $0x370] sm:$0xff]  ;;  %v287_v42 = vld [vmem:[#allocation2 + $0x3a8] sm:$0xff]  ;;  %v285_v43 = vld [vmem:[#allocation2 + $0x398] sm:$0xff]  ;;  %v1646_v45 = vpack.c.bf16 %v278_v37, %v274_v36 }
  0x5d   :  { %1757 = vmatprep.subr.bf16.mxu1 %v1756_v55  ;;  %v289_v44 = vld [vmem:[#allocation2 + $0x3b8] sm:$0xff]  ;;  %v1774_v46 = vpack.c.bf16 %v280_v40, %v276_v38  ;;  %v1648_v47 = vpack.c.bf16 %v287_v42, %v283_v41  ;;  %v282_v48 = vld [vmem:[#allocation2 + $0x380] sm:$0xff]  ;;  %v284_v50 = vld [vmem:[#allocation2 + $0x390] sm:$0xff] }
  0x5e   :  { %v286_v49 = vld [vmem:[#allocation2 + $0x3a0] sm:$0xff]  ;;  %v1776_v51 = vpack.c.bf16 %v289_v44, %v285_v43  ;;  %v288_v52 = vld [vmem:[#allocation2 + $0x3b0] sm:$0xff]  ;;  %v291_v53 = vld [vmem:[#allocation2 + $0x3c8] sm:$0xff] }
  0x5f   :  { %1631 = vmatpush1.bf16.msra.mxu0 %v1630_v61  ;;  %v295_v54 = vld [vmem:[#allocation2 + $0x3e8] sm:$0xff]  ;;  %v293_v55 = vld [vmem:[#allocation2 + $0x3d8] sm:$0xff]  ;;  %v1650_v57 = vpack.c.bf16 %v286_v49, %v282_v48  ;;  %v1778_v58 = vpack.c.bf16 %v288_v52, %v284_v50  ;;  %v290_v60 = vld [vmem:[#allocation2 + $0x3c0] sm:$0xff] }
  0x60   :  { %1759 = vmatpush1.bf16.msra.mxu1 %v1758_v62  ;;  %1633 = vmatprep.subr.bf16.mxu0 %v1632_v63  ;;  %v297_v56 = vld [vmem:[#allocation2 + $0x3f8] sm:$0xff]  ;;  %v1652_v59 = vpack.c.bf16 %v295_v54, %v291_v53  ;;  %v294_v61 = vld [vmem:[#allocation2 + $0x3e0] sm:$0xff]  ;;  %v292_v62 = vld [vmem:[#allocation2 + $0x3d0] sm:$0xff] }
  0x61   :  { %1761 = vmatprep.subr.bf16.mxu1 %v1760_v3  ;;  %v1780_v63 = vpack.c.bf16 %v297_v56, %v293_v55  ;;  %v296_v0 = vld [vmem:[#allocation2 + $0x3f0] sm:$0xff]  ;;  %v299_v1 = vld [vmem:[#allocation2 + $0x408] sm:$0xff]  ;;  %v301_v3 = vld [vmem:[#allocation2 + $0x418] sm:$0xff]  ;;  %v1654_v5 = vpack.c.bf16 %v294_v61, %v290_v60 }
  0x62   :  { %v303_v2 = vld [vmem:[#allocation2 + $0x428] sm:$0xff]  ;;  %v305_v4 = vld [vmem:[#allocation2 + $0x438] sm:$0xff]  ;;  %v1782_v6 = vpack.c.bf16 %v296_v0, %v292_v62  ;;  %v74_v12 = vld [vmem:[%s2432_s1] ss:$2 sm:$0xf] }
  0x63   :  { %1635 = vmatpush1.bf16.msra.mxu0 %v1634_v9  ;;  %v1656_v7 = vpack.c.bf16 %v303_v2, %v299_v1  ;;  %v1784_v8 = vpack.c.bf16 %v305_v4, %v301_v3  ;;  %v81_v9 = vlaneseq  ;;  %v1520_v17 = vld [vmem:[%s2432_s1 + $0x1] ss:$2 sm:$0xf]  ;;  %v298_v44 = vld [vmem:[#allocation2 + $0x400] sm:$0xff]  ;;  %v311_v53 = vld [vmem:[#allocation2 + $0x468] sm:$0xff] }
  0x64   :  { %1763 = vmatpush1.bf16.msra.mxu1 %v1762_v10  ;;  %1637 = vmatprep.subr.bf16.mxu0 %v1636_v11  ;;  %v309_v54 = vld [vmem:[#allocation2 + $0x458] sm:$0xff]  ;;  %v306_v60 = vld [vmem:[#allocation2 + $0x440] sm:$0xff]  ;;  %v308_v62 = vld [vmem:[#allocation2 + $0x450] sm:$0xff] }
  0x65   :  { %1765 = vmatprep.subr.bf16.mxu1 %v1764_v15  ;;  %v82_v10 = vshrl.u32 %v81_v9, 7  ;;  %v313_v55 = vld [vmem:[#allocation2 + $0x478] sm:$0xff]  ;;  %v310_v61 = vld [vmem:[#allocation2 + $0x460] sm:$0xff]  ;;  %v315_v0 = vld [vmem:[#allocation2 + $0x488] sm:$0xff] }
  0x66   :  { %v1788_v2 = vpack.c.bf16 %v313_v55, %v309_v54  ;;  %v319_v3 = vld [vmem:[#allocation2 + $0x4a8] sm:$0xff]  ;;  %v317_v4 = vld [vmem:[#allocation2 + $0x498] sm:$0xff]  ;;  %v314_v9 = vld [vmem:[#allocation2 + $0x480] sm:$0xff] }
  0x67   :  { %1639 = vmatpush1.bf16.msra.mxu0 %v1638_v21  ;;  %v2370_v11 = vsub.s32 2, %v82_v10  ;;  %v2375_v13 = vsub.s32 0, %v82_v10  ;;  %v2377_v14 = vsub.s32 1, %v82_v10  ;;  %v2380_v16 = vsub.s32 3, %v82_v10  ;;  %v318_v10 = vld [vmem:[#allocation2 + $0x4a0] sm:$0xff]  ;;  %v340_v54 = vld [vmem:[#allocation2 + $0x550] sm:$0xff] }
  0x68   :  { %1767 = vmatpush1.bf16.msra.mxu1 %v1766_v22  ;;  %1641 = vmatprep.subr.bf16.mxu0 %v1640_v23  ;;  %v140_v23 = vld [vmem:[%s2433_s2] sm:$0xf] }
  0x69   :  { %1769 = vmatprep.subr.bf16.mxu1 %v1768_v27  ;;  %v92_v15 = vrot.slane %v74_v12, %v2370_v11  ;;  %v84_v19 = vrot.slane %v74_v12, %v2375_v13  ;;  %v88_v20 = vrot.slane %v74_v12, %v2377_v14  ;;  %v96_v21 = vrot.slane %v74_v12, %v2380_v16  ;;  %v344_v55 = vld [vmem:[#allocation2 + $0x570] sm:$0xff] }
  0x6a   :  { %v115_v24 = vrot.slane %v1520_v17, %v2375_v13  ;;  %v119_v25 = vrot.slane %v1520_v17, %v2377_v14  ;;  %v123_v26 = vrot.slane %v1520_v17, %v2370_v11  ;;  %v127_v27 = vrot.slane %v1520_v17, %v2380_v16  ;;  %v316_v17 = vld [vmem:[#allocation2 + $0x490] sm:$0xff] }
  0x6b   :  { %1643 = vmatpush1.bf16.msra.mxu0 %v1642_v33  ;;  %v153_v28 = vrot.slane %v140_v23, %v2370_v11  ;;  %v149_v29 = vrot.slane %v140_v23, %v2377_v14  ;;  %v1664_v12 = vpack.c.bf16 %v319_v3, %v315_v0  ;;  %v352_v3 = vld [vmem:[#allocation2 + $0x5b0] sm:$0xff] }
  0x6c   :  { %1771 = vmatpush1.bf16.msra.mxu1 %v1770_v34  ;;  %1645 = vmatprep.subr.bf16.mxu0 %v1644_v35  ;;  %v145_v34 = vrot.slane %v140_v23, %v2375_v13 }
  0x6d   :  { %1773 = vmatprep.subr.bf16.mxu1 %v1772_v39  ;;  %v157_v39 = vrot.slane %v140_v23, %v2380_v16  ;;  %v1666_v23 = vpack.c.bf16 %v318_v10, %v314_v9  ;;  %v354_v10 = vld [vmem:[#allocation2 + $0x5c0] sm:$0xff] }
  0x6f   :  { %1647 = vmatpush1.bf16.msra.mxu0 %v1646_v45  ;;  %v302_v45 = vld [vmem:[#allocation2 + $0x420] sm:$0xff] }
  0x70   :  { %1775 = vmatpush1.bf16.msra.mxu1 %v1774_v46  ;;  %1649 = vmatprep.subr.bf16.mxu0 %v1648_v47  ;;  %v300_v46 = vld [vmem:[#allocation2 + $0x410] sm:$0xff] }
  0x71   :  { %1777 = vmatprep.subr.bf16.mxu1 %v1776_v51  ;;  %v304_v47 = vld [vmem:[#allocation2 + $0x430] sm:$0xff]  ;;  %v307_v51 = vld [vmem:[#allocation2 + $0x448] sm:$0xff] }
  0x72   :  { %v1660_v1 = vpack.c.bf16 %v311_v53, %v307_v51  ;;  %v342_v51 = vld [vmem:[#allocation2 + $0x560] sm:$0xff] }
  0x73   :  { %1651 = vmatpush1.bf16.msra.mxu0 %v1650_v57 }
  0x74   :  { %1779 = vmatpush1.bf16.msra.mxu1 %v1778_v58  ;;  %1653 = vmatprep.subr.bf16.mxu0 %v1652_v59  ;;  %v1658_v58 = vpack.c.bf16 %v302_v45, %v298_v44  ;;  %v1786_v59 = vpack.c.bf16 %v304_v47, %v300_v46  ;;  %v343_v44 = vld [vmem:[#allocation2 + $0x568] sm:$0xff]  ;;  %v341_v45 = vld [vmem:[#allocation2 + $0x558] sm:$0xff] }
  0x75   :  { %1781 = vmatprep.subr.bf16.mxu1 %v1780_v63  ;;  %v312_v63 = vld [vmem:[#allocation2 + $0x470] sm:$0xff]  ;;  %v345_v46 = vld [vmem:[#allocation2 + $0x578] sm:$0xff] }
  0x76   :  { %v1804_v53 = vpack.c.bf16 %v345_v46, %v341_v45  ;;  %v383_v45 = vld [vmem:[#allocation2 + $0x6a8] sm:$0xff]  ;;  %v381_v46 = vld [vmem:[#allocation2 + $0x698] sm:$0xff] }
  0x77   :  { %1655 = vmatpush1.bf16.msra.mxu0 %v1654_v5  ;;  %v321_v5 = vld [vmem:[#allocation2 + $0x4b8] sm:$0xff] }
  0x78   :  { %1783 = vmatpush1.bf16.msra.mxu1 %v1782_v6  ;;  %1657 = vmatprep.subr.bf16.mxu0 %v1656_v7  ;;  %v1662_v7 = vpack.c.bf16 %v310_v61, %v306_v60  ;;  %v1806_v61 = vpack.c.bf16 %v344_v55, %v340_v54  ;;  %v380_v55 = vld [vmem:[#allocation2 + $0x690] sm:$0xff] }
  0x79   :  { %1785 = vmatprep.subr.bf16.mxu1 %v1784_v8  ;;  %v1790_v8 = vpack.c.bf16 %v312_v63, %v308_v62  ;;  %v346_v62 = vld [vmem:[#allocation2 + $0x580] sm:$0xff] }
  0x7a   :  { %v350_v63 = vld [vmem:[#allocation2 + $0x5a0] sm:$0xff] }
  0xb7   :  { %v78_v18 = vpop.permute.xlu0 %77 }
  0xb8   :  { %v103_v22 = vmul.f32 %v92_v15, %v78_v18  ;;  %v101_v30 = vmul.f32 %v84_v19, %v78_v18  ;;  %v102_v31 = vmul.f32 %v88_v20, %v78_v18  ;;  %v104_v32 = vmul.f32 %v96_v21, %v78_v18  ;;  %v320_v18 = vld [vmem:[#allocation2 + $0x4b0] sm:$0xff]  ;;  %v323_v19 = vld [vmem:[#allocation2 + $0x4c8] sm:$0xff]  ;;  %v325_v21 = vld [vmem:[#allocation2 + $0x4d8] sm:$0xff] }
  0xb9   :  { %v1792_v15 = vpack.c.bf16 %v321_v5, %v317_v4  ;;  %v327_v20 = vld [vmem:[#allocation2 + $0x4e8] sm:$0xff] }
  0xba   :  { %v355_v4 = vld [vmem:[#allocation2 + $0x5c8] sm:$0xff] }
  0xbb   :  { %v359_v5 = vld [vmem:[#allocation2 + $0x5e8] sm:$0xff] }
  0xbc   :  { %v109_v33 = vpop.permute.xlu0 %108 }
  0xbd   :  { %v132_v35 = vmul.f32 %v115_v24, %v109_v33  ;;  %v133_v36 = vmul.f32 %v119_v25, %v109_v33  ;;  %v134_v37 = vmul.f32 %v123_v26, %v109_v33  ;;  %v135_v38 = vmul.f32 %v127_v27, %v109_v33  ;;  %v322_v25 = vld [vmem:[#allocation2 + $0x4c0] sm:$0xff]  ;;  %v333_v33 = vld [vmem:[#allocation2 + $0x518] sm:$0xff] }
  0xbe   :  { %v1794_v24 = vpack.c.bf16 %v320_v18, %v316_v17  ;;  %v326_v26 = vld [vmem:[#allocation2 + $0x4e0] sm:$0xff]  ;;  %v1668_v27 = vpack.c.bf16 %v327_v20, %v323_v19  ;;  %v356_v18 = vld [vmem:[#allocation2 + $0x5d0] sm:$0xff]  ;;  %v363_v20 = vld [vmem:[#allocation2 + $0x608] sm:$0xff] }
  0xbf   :  { %v136_v40 = vadd.f32 %v132_v35, %v101_v30  ;;  %v138_v41 = vadd.f32 %v134_v37, %v103_v22  ;;  %v139_v42 = vadd.f32 %v135_v38, %v104_v32  ;;  %v137_v43 = vadd.f32 %v133_v36, %v102_v31  ;;  %v329_v22 = vld [vmem:[#allocation2 + $0x4f8] sm:$0xff]  ;;  %v328_v30 = vld [vmem:[#allocation2 + $0x4f0] sm:$0xff]  ;;  %v331_v31 = vld [vmem:[#allocation2 + $0x508] sm:$0xff] }
  0xc0   :  { %v335_v32 = vld [vmem:[#allocation2 + $0x528] sm:$0xff]  ;;  %v1670_v35 = vpack.c.bf16 %v326_v26, %v322_v25  ;;  %v330_v37 = vld [vmem:[#allocation2 + $0x500] sm:$0xff]  ;;  %v360_v19 = vld [vmem:[#allocation2 + $0x5f0] sm:$0xff] }
  0xc1   :  { %v2399_v48 = vadd.f32 %v153_v28, %v138_v41  ;;  %v163_v49 = vadd.f32 %v149_v29, %v137_v43  ;;  %v162_v50 = vadd.f32 %v145_v34, %v136_v40  ;;  %v165_v52 = vadd.f32 %v157_v39, %v139_v42  ;;  %v324_v29 = vld [vmem:[#allocation2 + $0x4d0] sm:$0xff]  ;;  %v337_v34 = vld [vmem:[#allocation2 + $0x538] sm:$0xff]  ;;  %v334_v38 = vld [vmem:[#allocation2 + $0x520] sm:$0xff] }
  0xc2   :  { %v1796_v28 = vpack.c.bf16 %v329_v22, %v325_v21  ;;  %v1798_v36 = vpack.c.bf16 %v328_v30, %v324_v29  ;;  %v1672_v39 = vpack.c.bf16 %v335_v32, %v331_v31  ;;  %v1800_v40 = vpack.c.bf16 %v337_v34, %v333_v33  ;;  %v332_v41 = vld [vmem:[#allocation2 + $0x510] sm:$0xff]  ;;  %v339_v43 = vld [vmem:[#allocation2 + $0x548] sm:$0xff]  ;;  %v365_v22 = vld [vmem:[#allocation2 + $0x618] sm:$0xff] }
  0xc3   :  { %v167_v56 = vmax.f32 %v163_v49, 0.0  ;;  %v166_v57 = vmax.f32 %v162_v50, 0.0  ;;  %v169_v6 = vmax.f32 %v165_v52, 0.0  ;;  %v336_v42 = vld [vmem:[#allocation2 + $0x530] sm:$0xff]  ;;  %v1674_v47 = vpack.c.bf16 %v334_v38, %v330_v37  ;;  %v338_v50 = vld [vmem:[#allocation2 + $0x540] sm:$0xff]  ;;  %v367_v21 = vld [vmem:[#allocation2 + $0x628] sm:$0xff] }
  0xc4   :  { %v1802_v49 = vpack.c.bf16 %v336_v42, %v332_v41  ;;  %v1676_v52 = vpack.c.bf16 %v343_v44, %v339_v43  ;;  %v1678_v60 = vpack.c.bf16 %v342_v51, %v338_v50  ;;  %v1814_v25 = vpack.c.bf16 %v360_v19, %v356_v18  ;;  %v362_v26 = vld [vmem:[#allocation2 + $0x600] sm:$0xff]  ;;  %v364_v30 = vld [vmem:[#allocation2 + $0x610] sm:$0xff]  ;;  %v371_v32 = vld [vmem:[#allocation2 + $0x648] sm:$0xff] }
  0xc5   :  { %512 = vmatprep.mubr.f32.mxu0 %v167_v56  ;;  %654 = vmatprep.mubr.f32.mxu1 %v167_v56  ;;  %v347_v56 = vld [vmem:[#allocation2 + $0x588] sm:$0xff]  ;;  %v368_v31 = vld [vmem:[#allocation2 + $0x630] sm:$0xff]  ;;  %v373_v34 = vld [vmem:[#allocation2 + $0x658] sm:$0xff] }
  0xc6   :  { %513 = vmatmul.mubr.f32.vlgmr.msra.gmra.mrb[0].mxu0 %v166_v57  ;;  %655 = vmatmul.mubr.f32.vlgmr.msra.gmra.mrb[0].mxu1 %v166_v57  ;;  %v351_v57 = vld [vmem:[#allocation2 + $0x5a8] sm:$0xff]  ;;  %v1818_v37 = vpack.c.bf16 %v368_v31, %v364_v30  ;;  %v370_v38 = vld [vmem:[#allocation2 + $0x640] sm:$0xff]  ;;  %v372_v42 = vld [vmem:[#allocation2 + $0x650] sm:$0xff] }
  0xc7   :  { %1659 = vmatpush1.bf16.msra.mxu0 %v1658_v58  ;;  %1787 = vmatpush1.bf16.msra.mxu1 %v1786_v59  ;;  %v349_v58 = vld [vmem:[#allocation2 + $0x598] sm:$0xff]  ;;  %v1680_v0 = vpack.c.bf16 %v351_v57, %v347_v56  ;;  %v375_v33 = vld [vmem:[#allocation2 + $0x668] sm:$0xff]  ;;  %v376_v43 = vld [vmem:[#allocation2 + $0x670] sm:$0xff] }
  0xc8   :  { %583 = vmatprep.mubr.f32.mxu0 %v169_v6  ;;  %725 = vmatprep.mubr.f32.mxu1 %v169_v6  ;;  %v353_v59 = vld [vmem:[#allocation2 + $0x5b8] sm:$0xff]  ;;  %v379_v44 = vld [vmem:[#allocation2 + $0x688] sm:$0xff]  ;;  %v1822_v50 = vpack.c.bf16 %v376_v43, %v372_v42  ;;  %v378_v51 = vld [vmem:[#allocation2 + $0x680] sm:$0xff] }
  0xc9   :  { %1661 = vmatprep.subr.bf16.mxu0 %v1660_v1  ;;  %1789 = vmatprep.subr.bf16.mxu1 %v1788_v2  ;;  %v1808_v1 = vpack.c.bf16 %v353_v59, %v349_v58  ;;  %v348_v2 = vld [vmem:[#allocation2 + $0x590] sm:$0xff]  ;;  %v357_v6 = vld [vmem:[#allocation2 + $0x5d8] sm:$0xff]  ;;  %v387_v57 = vld [vmem:[#allocation2 + $0x6c8] sm:$0xff] }
  0xca   :  { %v1810_v9 = vpack.c.bf16 %v352_v3, %v348_v2  ;;  %v384_v56 = vld [vmem:[#allocation2 + $0x6b0] sm:$0xff]  ;;  %v391_v58 = vld [vmem:[#allocation2 + $0x6e8] sm:$0xff]  ;;  %v389_v59 = vld [vmem:[#allocation2 + $0x6d8] sm:$0xff] }
  0xcb   :  { %1663 = vmatpush1.bf16.msra.mxu0 %v1662_v7  ;;  %1791 = vmatpush1.bf16.msra.mxu1 %v1790_v8  ;;  %v361_v7 = vld [vmem:[#allocation2 + $0x5f8] sm:$0xff]  ;;  %v1682_v8 = vpack.c.bf16 %v350_v63, %v346_v62  ;;  %v1826_v62 = vpack.c.bf16 %v384_v56, %v380_v55  ;;  %v386_v63 = vld [vmem:[#allocation2 + $0x6c0] sm:$0xff]  ;;  %v388_v3 = vld [vmem:[#allocation2 + $0x6d0] sm:$0xff] }
  0xcc   :  { %1665 = vmatprep.subr.bf16.mxu0 %v1664_v12  ;;  %1793 = vmatprep.subr.bf16.mxu1 %v1792_v15  ;;  %v358_v12 = vld [vmem:[#allocation2 + $0x5e0] sm:$0xff]  ;;  %v1684_v15 = vpack.c.bf16 %v359_v5, %v355_v4  ;;  %v1812_v17 = vpack.c.bf16 %v361_v7, %v357_v6  ;;  %v392_v4 = vld [vmem:[#allocation2 + $0x6f0] sm:$0xff]  ;;  %v395_v5 = vld [vmem:[#allocation2 + $0x708] sm:$0xff] }
  0xcd   :  { %v399_v6 = vld [vmem:[#allocation2 + $0x728] sm:$0xff]  ;;  %v397_v7 = vld [vmem:[#allocation2 + $0x718] sm:$0xff]  ;;  %v396_v19 = vld [vmem:[#allocation2 + $0x710] sm:$0xff] }
  0xce   :  { %v404_v31 = vld [vmem:[#allocation2 + $0x750] sm:$0xff] }
  0xcf   :  { %1667 = vmatpush1.bf16.msra.mxu0 %v1666_v23  ;;  %1795 = vmatpush1.bf16.msra.mxu1 %v1794_v24  ;;  %v369_v23 = vld [vmem:[#allocation2 + $0x638] sm:$0xff]  ;;  %v1686_v24 = vpack.c.bf16 %v358_v12, %v354_v10  ;;  %v1830_v10 = vpack.c.bf16 %v392_v4, %v388_v3  ;;  %v394_v12 = vld [vmem:[#allocation2 + $0x700] sm:$0xff]  ;;  %v412_v43 = vld [vmem:[#allocation2 + $0x790] sm:$0xff] }
  0xd0   :  { %1669 = vmatprep.subr.bf16.mxu0 %v1668_v27  ;;  %1797 = vmatprep.subr.bf16.mxu1 %v1796_v28  ;;  %v366_v27 = vld [vmem:[#allocation2 + $0x620] sm:$0xff]  ;;  %v1688_v28 = vpack.c.bf16 %v367_v21, %v363_v20  ;;  %v1816_v29 = vpack.c.bf16 %v369_v23, %v365_v22  ;;  %v400_v20 = vld [vmem:[#allocation2 + $0x730] sm:$0xff]  ;;  %v403_v21 = vld [vmem:[#allocation2 + $0x748] sm:$0xff] }
  0xd1   :  { %v407_v22 = vld [vmem:[#allocation2 + $0x768] sm:$0xff]  ;;  %v405_v23 = vld [vmem:[#allocation2 + $0x758] sm:$0xff]  ;;  %v420_v56 = vld [vmem:[#allocation2 + $0x7d0] sm:$0xff] }
  0xd2   :  { %v738_v4 = vld [vmem:[#allocation4 + $0x10] sm:$0xff] }
  0xd3   :  { %1671 = vmatpush1.bf16.msra.mxu0 %v1670_v35  ;;  %1799 = vmatpush1.bf16.msra.mxu1 %v1798_v36  ;;  %v377_v35 = vld [vmem:[#allocation2 + $0x678] sm:$0xff]  ;;  %v1690_v36 = vpack.c.bf16 %v366_v27, %v362_v26  ;;  %v1834_v26 = vpack.c.bf16 %v400_v20, %v396_v19  ;;  %v402_v27 = vld [vmem:[#allocation2 + $0x740] sm:$0xff] }
  0xd4   :  { %1673 = vmatprep.subr.bf16.mxu0 %v1672_v39  ;;  %1801 = vmatprep.subr.bf16.mxu1 %v1800_v40  ;;  %v374_v39 = vld [vmem:[#allocation2 + $0x660] sm:$0xff]  ;;  %v1692_v40 = vpack.c.bf16 %v375_v33, %v371_v32  ;;  %v1820_v41 = vpack.c.bf16 %v377_v35, %v373_v34  ;;  %v408_v32 = vld [vmem:[#allocation2 + $0x770] sm:$0xff]  ;;  %v411_v33 = vld [vmem:[#allocation2 + $0x788] sm:$0xff] }
  0xd5   :  { %v415_v34 = vld [vmem:[#allocation2 + $0x7a8] sm:$0xff]  ;;  %v413_v35 = vld [vmem:[#allocation2 + $0x798] sm:$0xff] }
  0xd7   :  { %1675 = vmatpush1.bf16.msra.mxu0 %v1674_v47  ;;  %1803 = vmatpush1.bf16.msra.mxu1 %v1802_v49  ;;  %v385_v47 = vld [vmem:[#allocation2 + $0x6b8] sm:$0xff]  ;;  %v1694_v49 = vpack.c.bf16 %v374_v39, %v370_v38  ;;  %v1838_v38 = vpack.c.bf16 %v408_v32, %v404_v31  ;;  %v410_v39 = vld [vmem:[#allocation2 + $0x780] sm:$0xff]  ;;  %v754_v32 = vld [vmem:[#allocation4 + $0x90] sm:$0xff] }
  0xd8   :  { %1677 = vmatprep.subr.bf16.mxu0 %v1676_v52  ;;  %1805 = vmatprep.subr.bf16.mxu1 %v1804_v53  ;;  %v382_v52 = vld [vmem:[#allocation2 + $0x6a0] sm:$0xff]  ;;  %v1696_v53 = vpack.c.bf16 %v383_v45, %v379_v44  ;;  %v1824_v54 = vpack.c.bf16 %v385_v47, %v381_v46  ;;  %v416_v44 = vld [vmem:[#allocation2 + $0x7b0] sm:$0xff]  ;;  %v419_v45 = vld [vmem:[#allocation2 + $0x7c8] sm:$0xff] }
  0xd9   :  { %v423_v46 = vld [vmem:[#allocation2 + $0x7e8] sm:$0xff]  ;;  %v421_v47 = vld [vmem:[#allocation2 + $0x7d8] sm:$0xff] }
  0xdb   :  { %1679 = vmatpush1.bf16.msra.mxu0 %v1678_v60  ;;  %1807 = vmatpush1.bf16.msra.mxu1 %v1806_v61  ;;  %v393_v60 = vld [vmem:[#allocation2 + $0x6f8] sm:$0xff]  ;;  %v1698_v61 = vpack.c.bf16 %v382_v52, %v378_v51  ;;  %v1842_v51 = vpack.c.bf16 %v416_v44, %v412_v43  ;;  %v418_v52 = vld [vmem:[#allocation2 + $0x7c0] sm:$0xff]  ;;  %v762_v44 = vld [vmem:[#allocation4 + $0xd0] sm:$0xff] }
  0xdc   :  { %1681 = vmatprep.subr.bf16.mxu0 %v1680_v0  ;;  %1809 = vmatprep.subr.bf16.mxu1 %v1808_v1  ;;  %v390_v0 = vld [vmem:[#allocation2 + $0x6e0] sm:$0xff]  ;;  %v1700_v1 = vpack.c.bf16 %v391_v58, %v387_v57  ;;  %v1828_v2 = vpack.c.bf16 %v393_v60, %v389_v59  ;;  %v424_v57 = vld [vmem:[#allocation2 + $0x7f0] sm:$0xff]  ;;  %v737_v58 = vld [vmem:[#allocation4 + $0x8] sm:$0xff] }
  0xdd   :  { %v741_v59 = vld [vmem:[#allocation4 + $0x28] sm:$0xff]  ;;  %v739_v60 = vld [vmem:[#allocation4 + $0x18] sm:$0xff] }
  0xdf   :  { %1683 = vmatpush1.bf16.msra.mxu0 %v1682_v8  ;;  %1811 = vmatpush1.bf16.msra.mxu1 %v1810_v9  ;;  %v401_v8 = vld [vmem:[#allocation2 + $0x738] sm:$0xff]  ;;  %v1702_v9 = vpack.c.bf16 %v390_v0, %v386_v63  ;;  %v1846_v63 = vpack.c.bf16 %v424_v57, %v420_v56  ;;  %v736_v0 = vld [vmem:[#allocation4] sm:$0xff]  ;;  %v770_v57 = vld [vmem:[#allocation4 + $0x110] sm:$0xff] }
  0xe0   :  { %1685 = vmatprep.subr.bf16.mxu0 %v1684_v15  ;;  %1813 = vmatprep.subr.bf16.mxu1 %v1812_v17  ;;  %v398_v15 = vld [vmem:[#allocation2 + $0x720] sm:$0xff]  ;;  %v1704_v17 = vpack.c.bf16 %v399_v6, %v395_v5  ;;  %v1832_v18 = vpack.c.bf16 %v401_v8, %v397_v7  ;;  %v742_v5 = vld [vmem:[#allocation4 + $0x30] sm:$0xff]  ;;  %v745_v6 = vld [vmem:[#allocation4 + $0x48] sm:$0xff] }
  0xe1   :  { %v749_v7 = vld [vmem:[#allocation4 + $0x68] sm:$0xff]  ;;  %v747_v8 = vld [vmem:[#allocation4 + $0x58] sm:$0xff] }
  0xe2   :  { %v1852_v19 = vpack.c.bf16 %v749_v7, %v745_v6  ;;  %v782_v6 = vld [vmem:[#allocation4 + $0x170] sm:$0xff]  ;;  %v785_v7 = vld [vmem:[#allocation4 + $0x188] sm:$0xff] }
  0xe3   :  { %1687 = vmatpush1.bf16.msra.mxu0 %v1686_v24  ;;  %1815 = vmatpush1.bf16.msra.mxu1 %v1814_v25  ;;  %v409_v24 = vld [vmem:[#allocation2 + $0x778] sm:$0xff]  ;;  %v1706_v25 = vpack.c.bf16 %v398_v15, %v394_v12  ;;  %v1978_v12 = vpack.c.bf16 %v742_v5, %v738_v4  ;;  %v744_v15 = vld [vmem:[#allocation4 + $0x40] sm:$0xff]  ;;  %v778_v5 = vld [vmem:[#allocation4 + $0x150] sm:$0xff] }
  0xe4   :  { %1689 = vmatprep.subr.bf16.mxu0 %v1688_v28  ;;  %1817 = vmatprep.subr.bf16.mxu1 %v1816_v29  ;;  %v406_v28 = vld [vmem:[#allocation2 + $0x760] sm:$0xff]  ;;  %v1708_v29 = vpack.c.bf16 %v407_v22, %v403_v21  ;;  %v1836_v30 = vpack.c.bf16 %v409_v24, %v405_v23  ;;  %v746_v21 = vld [vmem:[#allocation4 + $0x50] sm:$0xff]  ;;  %v753_v23 = vld [vmem:[#allocation4 + $0x88] sm:$0xff] }
  0xe5   :  { %v750_v22 = vld [vmem:[#allocation4 + $0x70] sm:$0xff]  ;;  %v757_v24 = vld [vmem:[#allocation4 + $0xa8] sm:$0xff] }
  0xe7   :  { %1691 = vmatpush1.bf16.msra.mxu0 %v1690_v36  ;;  %1819 = vmatpush1.bf16.msra.mxu1 %v1818_v37  ;;  %v417_v36 = vld [vmem:[#allocation2 + $0x7b8] sm:$0xff]  ;;  %v1710_v37 = vpack.c.bf16 %v406_v28, %v402_v27  ;;  %v1982_v28 = vpack.c.bf16 %v750_v22, %v746_v21  ;;  %v786_v21 = vld [vmem:[#allocation4 + $0x190] sm:$0xff] }
  0xe8   :  { %1693 = vmatprep.subr.bf16.mxu0 %v1692_v40  ;;  %1821 = vmatprep.subr.bf16.mxu1 %v1820_v41  ;;  %v414_v40 = vld [vmem:[#allocation2 + $0x7a0] sm:$0xff]  ;;  %v1712_v41 = vpack.c.bf16 %v415_v34, %v411_v33  ;;  %v1840_v42 = vpack.c.bf16 %v417_v36, %v413_v35  ;;  %v758_v33 = vld [vmem:[#allocation4 + $0xb0] sm:$0xff]  ;;  %v761_v34 = vld [vmem:[#allocation4 + $0xc8] sm:$0xff] }
  0xe9   :  { %v765_v35 = vld [vmem:[#allocation4 + $0xe8] sm:$0xff]  ;;  %v763_v36 = vld [vmem:[#allocation4 + $0xd8] sm:$0xff]  ;;  %v790_v22 = vld [vmem:[#allocation4 + $0x1b0] sm:$0xff] }
  0xeb   :  { %1695 = vmatpush1.bf16.msra.mxu0 %v1694_v49  ;;  %1823 = vmatpush1.bf16.msra.mxu1 %v1822_v50  ;;  %v425_v49 = vld [vmem:[#allocation2 + $0x7f8] sm:$0xff]  ;;  %v1714_v50 = vpack.c.bf16 %v414_v40, %v410_v39  ;;  %v1986_v39 = vpack.c.bf16 %v758_v33, %v754_v32  ;;  %v760_v40 = vld [vmem:[#allocation4 + $0xc0] sm:$0xff]  ;;  %v794_v32 = vld [vmem:[#allocation4 + $0x1d0] sm:$0xff] }
  0xec   :  { %1697 = vmatprep.subr.bf16.mxu0 %v1696_v53  ;;  %1825 = vmatprep.subr.bf16.mxu1 %v1824_v54  ;;  %v422_v53 = vld [vmem:[#allocation2 + $0x7e0] sm:$0xff]  ;;  %v1716_v54 = vpack.c.bf16 %v423_v46, %v419_v45  ;;  %v1844_v55 = vpack.c.bf16 %v425_v49, %v421_v47  ;;  %v766_v45 = vld [vmem:[#allocation4 + $0xf0] sm:$0xff]  ;;  %v769_v46 = vld [vmem:[#allocation4 + $0x108] sm:$0xff] }
  0xed   :  { %v773_v47 = vld [vmem:[#allocation4 + $0x128] sm:$0xff]  ;;  %v771_v49 = vld [vmem:[#allocation4 + $0x118] sm:$0xff]  ;;  %v798_v33 = vld [vmem:[#allocation4 + $0x1f0] sm:$0xff] }
  0xef   :  { %1699 = vmatpush1.bf16.msra.mxu0 %v1698_v61  ;;  %1827 = vmatpush1.bf16.msra.mxu1 %v1826_v62  ;;  %v743_v61 = vld [vmem:[#allocation4 + $0x38] sm:$0xff]  ;;  %v1718_v62 = vpack.c.bf16 %v422_v53, %v418_v52  ;;  %v1990_v52 = vpack.c.bf16 %v766_v45, %v762_v44  ;;  %v768_v53 = vld [vmem:[#allocation4 + $0x100] sm:$0xff]  ;;  %v802_v44 = vld [vmem:[#allocation4 + $0x210] sm:$0xff] }
  0xf0   :  { %1701 = vmatprep.subr.bf16.mxu0 %v1700_v1  ;;  %1829 = vmatprep.subr.bf16.mxu1 %v1828_v2  ;;  %v740_v1 = vld [vmem:[#allocation4 + $0x20] sm:$0xff]  ;;  %v1848_v2 = vpack.c.bf16 %v741_v59, %v737_v58  ;;  %v1976_v3 = vpack.c.bf16 %v743_v61, %v739_v60  ;;  %v774_v58 = vld [vmem:[#allocation4 + $0x130] sm:$0xff]  ;;  %v777_v59 = vld [vmem:[#allocation4 + $0x148] sm:$0xff] }
  0xf1   :  { %v781_v60 = vld [vmem:[#allocation4 + $0x168] sm:$0xff]  ;;  %v779_v61 = vld [vmem:[#allocation4 + $0x158] sm:$0xff]  ;;  %v806_v45 = vld [vmem:[#allocation4 + $0x230] sm:$0xff] }
  0xf3   :  { %1703 = vmatpush1.bf16.msra.mxu0 %v1702_v9  ;;  %1831 = vmatpush1.bf16.msra.mxu1 %v1830_v10  ;;  %v751_v9 = vld [vmem:[#allocation4 + $0x78] sm:$0xff]  ;;  %v1850_v10 = vpack.c.bf16 %v740_v1, %v736_v0  ;;  %v1994_v0 = vpack.c.bf16 %v774_v58, %v770_v57  ;;  %v776_v1 = vld [vmem:[#allocation4 + $0x140] sm:$0xff]  ;;  %v810_v57 = vld [vmem:[#allocation4 + $0x250] sm:$0xff] }
  0xf4   :  { %1705 = vmatprep.subr.bf16.mxu0 %v1704_v17  ;;  %1833 = vmatprep.subr.bf16.mxu1 %v1832_v18  ;;  %v748_v17 = vld [vmem:[#allocation4 + $0x60] sm:$0xff]  ;;  %v168_v18 = vmax.f32 %v2399_v48, 0.0  ;;  %v1980_v20 = vpack.c.bf16 %v751_v9, %v747_v8  ;;  %v1856_v48 = vpack.c.bf16 %v757_v24, %v753_v23  ;;  %v789_v8 = vld [vmem:[#allocation4 + $0x1a8] sm:$0xff]  ;;  %v787_v9 = vld [vmem:[#allocation4 + $0x198] sm:$0xff] }
  0xf5   :  { %v1854_v27 = vpack.c.bf16 %v748_v17, %v744_v15  ;;  %v1998_v15 = vpack.c.bf16 %v782_v6, %v778_v5  ;;  %v784_v17 = vld [vmem:[#allocation4 + $0x180] sm:$0xff]  ;;  %v793_v23 = vld [vmem:[#allocation4 + $0x1c8] sm:$0xff]  ;;  %v814_v58 = vld [vmem:[#allocation4 + $0x270] sm:$0xff] }
  0xf6   :  { %v797_v24 = vld [vmem:[#allocation4 + $0x1e8] sm:$0xff]  ;;  %v818_v5 = vld [vmem:[#allocation4 + $0x290] sm:$0xff] }
  0xf7   :  { %1707 = vmatpush1.bf16.msra.mxu0 %v1706_v25  ;;  %1835 = vmatpush1.bf16.msra.mxu1 %v1834_v26  ;;  %v755_v25 = vld [vmem:[#allocation4 + $0x98] sm:$0xff]  ;;  %v822_v6 = vld [vmem:[#allocation4 + $0x2b0] sm:$0xff] }
  0xf8   :  { %1709 = vmatprep.subr.bf16.mxu0 %v1708_v29  ;;  %1837 = vmatprep.subr.bf16.mxu1 %v1836_v30  ;;  %v759_v26 = vld [vmem:[#allocation4 + $0xb8] sm:$0xff]  ;;  %v752_v29 = vld [vmem:[#allocation4 + $0x80] sm:$0xff] }
  0xf9   :  { %v756_v30 = vld [vmem:[#allocation4 + $0xa0] sm:$0xff]  ;;  %v1984_v31 = vpack.c.bf16 %v759_v26, %v755_v25  ;;  %v795_v25 = vld [vmem:[#allocation4 + $0x1d8] sm:$0xff] }
  0xfa   :  { %v799_v26 = vld [vmem:[#allocation4 + $0x1f8] sm:$0xff] }
  0xfb   :  { %1711 = vmatpush1.bf16.msra.mxu0 %v1710_v37  ;;  %1839 = vmatpush1.bf16.msra.mxu1 %v1838_v38  ;;  %v767_v37 = vld [vmem:[#allocation4 + $0xf8] sm:$0xff]  ;;  %v1858_v38 = vpack.c.bf16 %v756_v30, %v752_v29  ;;  %v792_v29 = vld [vmem:[#allocation4 + $0x1c0] sm:$0xff] }
  0xfc   :  { %1713 = vmatprep.subr.bf16.mxu0 %v1712_v41  ;;  %1841 = vmatprep.subr.bf16.mxu1 %v1840_v42  ;;  %v764_v41 = vld [vmem:[#allocation4 + $0xe0] sm:$0xff]  ;;  %v1860_v42 = vpack.c.bf16 %v765_v35, %v761_v34  ;;  %v1988_v43 = vpack.c.bf16 %v767_v37, %v763_v36  ;;  %v801_v34 = vld [vmem:[#allocation4 + $0x208] sm:$0xff]  ;;  %v803_v36 = vld [vmem:[#allocation4 + $0x218] sm:$0xff] }
  0xfd   :  { %v796_v30 = vld [vmem:[#allocation4 + $0x1e0] sm:$0xff]  ;;  %v805_v35 = vld [vmem:[#allocation4 + $0x228] sm:$0xff]  ;;  %v807_v37 = vld [vmem:[#allocation4 + $0x238] sm:$0xff] }
  0xff   :  { %1715 = vmatpush1.bf16.msra.mxu0 %v1714_v50  ;;  %1843 = vmatpush1.bf16.msra.mxu1 %v1842_v51  ;;  %v775_v50 = vld [vmem:[#allocation4 + $0x138] sm:$0xff]  ;;  %v1862_v51 = vpack.c.bf16 %v764_v41, %v760_v40  ;;  %v800_v40 = vld [vmem:[#allocation4 + $0x200] sm:$0xff] }
 0x100   :  { %1717 = vmatprep.subr.bf16.mxu0 %v1716_v54  ;;  %1845 = vmatprep.subr.bf16.mxu1 %v1844_v55  ;;  %v772_v54 = vld [vmem:[#allocation4 + $0x120] sm:$0xff]  ;;  %v1864_v55 = vpack.c.bf16 %v773_v47, %v769_v46  ;;  %v1992_v56 = vpack.c.bf16 %v775_v50, %v771_v49  ;;  %v809_v46 = vld [vmem:[#allocation4 + $0x248] sm:$0xff]  ;;  %v811_v49 = vld [vmem:[#allocation4 + $0x258] sm:$0xff] }
 0x101   :  { %v804_v41 = vld [vmem:[#allocation4 + $0x220] sm:$0xff]  ;;  %v813_v47 = vld [vmem:[#allocation4 + $0x268] sm:$0xff]  ;;  %v815_v50 = vld [vmem:[#allocation4 + $0x278] sm:$0xff] }
 0x103   :  { %1719 = vmatpush1.bf16.msra.mxu0 %v1718_v62  ;;  %1847 = vmatpush1.bf16.msra.mxu1 %v1846_v63  ;;  %v783_v62 = vld [vmem:[#allocation4 + $0x178] sm:$0xff]  ;;  %v1866_v63 = vpack.c.bf16 %v772_v54, %v768_v53  ;;  %v808_v53 = vld [vmem:[#allocation4 + $0x240] sm:$0xff] }
 0x104   :  { %1849 = vmatprep.subr.bf16.mxu0 %v1848_v2  ;;  %1977 = vmatprep.subr.bf16.mxu1 %v1976_v3  ;;  %v780_v2 = vld [vmem:[#allocation4 + $0x160] sm:$0xff]  ;;  %v1868_v3 = vpack.c.bf16 %v781_v60, %v777_v59  ;;  %v1996_v4 = vpack.c.bf16 %v783_v62, %v779_v61  ;;  %v817_v59 = vld [vmem:[#allocation4 + $0x288] sm:$0xff]  ;;  %v819_v61 = vld [vmem:[#allocation4 + $0x298] sm:$0xff] }
 0x105   :  { %v812_v54 = vld [vmem:[#allocation4 + $0x260] sm:$0xff]  ;;  %v821_v60 = vld [vmem:[#allocation4 + $0x2a8] sm:$0xff]  ;;  %v823_v62 = vld [vmem:[#allocation4 + $0x2b8] sm:$0xff] }
 0x106   :  { %584 = vmatmul.mubr.f32.vlgmr.msra.gmra.mrb[0].mxu0 %v168_v18  ;;  %726 = vmatmul.mubr.f32.vlgmr.msra.gmra.mrb[0].mxu1 %v168_v18  ;;  %v788_v18 = vld [vmem:[#allocation4 + $0x1a0] sm:$0xff] }
 0x107   :  { %1851 = vmatpush1.bf16.msra.mxu0 %v1850_v10  ;;  %1979 = vmatpush1.bf16.msra.mxu1 %v1978_v12  ;;  %v791_v10 = vld [vmem:[#allocation4 + $0x1b8] sm:$0xff]  ;;  %v1870_v12 = vpack.c.bf16 %v780_v2, %v776_v1  ;;  %v816_v1 = vld [vmem:[#allocation4 + $0x280] sm:$0xff] }
 0x108   :  { %1853 = vmatprep.subr.bf16.mxu0 %v1852_v19  ;;  %1981 = vmatprep.subr.bf16.mxu1 %v1980_v20  ;;  %v1872_v19 = vpack.c.bf16 %v789_v8, %v785_v7  ;;  %v2000_v20 = vpack.c.bf16 %v791_v10, %v787_v9  ;;  %v820_v2 = vld [vmem:[#allocation4 + $0x2a0] sm:$0xff]  ;;  %v825_v7 = vld [vmem:[#allocation4 + $0x2c8] sm:$0xff]  ;;  %v827_v9 = vld [vmem:[#allocation4 + $0x2d8] sm:$0xff] }
 0x109   :  { %v829_v8 = vld [vmem:[#allocation4 + $0x2e8] sm:$0xff]  ;;  %v831_v10 = vld [vmem:[#allocation4 + $0x2f8] sm:$0xff] }
 0x10b   :  { %1855 = vmatpush1.bf16.msra.mxu0 %v1854_v27  ;;  %1983 = vmatpush1.bf16.msra.mxu1 %v1982_v28  ;;  %v1874_v27 = vpack.c.bf16 %v788_v18, %v784_v17  ;;  %v2002_v28 = vpack.c.bf16 %v790_v22, %v786_v21  ;;  %v824_v17 = vld [vmem:[#allocation4 + $0x2c0] sm:$0xff]  ;;  %v826_v21 = vld [vmem:[#allocation4 + $0x2d0] sm:$0xff] }
 0x10c   :  { %1857 = vmatprep.subr.bf16.mxu0 %v1856_v48  ;;  %1985 = vmatprep.subr.bf16.mxu1 %v1984_v31  ;;  %v1876_v48 = vpack.c.bf16 %v797_v24, %v793_v23  ;;  %v2004_v31 = vpack.c.bf16 %v799_v26, %v795_v25  ;;  %v828_v18 = vld [vmem:[#allocation4 + $0x2e0] sm:$0xff]  ;;  %v830_v22 = vld [vmem:[#allocation4 + $0x2f0] sm:$0xff]  ;;  %v833_v23 = vld [vmem:[#allocation4 + $0x308] sm:$0xff] }
 0x10d   :  { %v837_v24 = vld [vmem:[#allocation4 + $0x328] sm:$0xff]  ;;  %v835_v25 = vld [vmem:[#allocation4 + $0x318] sm:$0xff] }
 0x10e   :  { %v839_v26 = vld [vmem:[#allocation4 + $0x338] sm:$0xff] }
 0x10f   :  { %1859 = vmatpush1.bf16.msra.mxu0 %v1858_v38  ;;  %1987 = vmatpush1.bf16.msra.mxu1 %v1986_v39  ;;  %v1878_v38 = vpack.c.bf16 %v796_v30, %v792_v29  ;;  %v2006_v39 = vpack.c.bf16 %v798_v33, %v794_v32  ;;  %v832_v29 = vld [vmem:[#allocation4 + $0x300] sm:$0xff]  ;;  %v834_v32 = vld [vmem:[#allocation4 + $0x310] sm:$0xff] }
 0x110   :  { %1861 = vmatprep.subr.bf16.mxu0 %v1860_v42  ;;  %1989 = vmatprep.subr.bf16.mxu1 %v1988_v43  ;;  %v1880_v42 = vpack.c.bf16 %v805_v35, %v801_v34  ;;  %v2008_v43 = vpack.c.bf16 %v807_v37, %v803_v36  ;;  %v836_v30 = vld [vmem:[#allocation4 + $0x320] sm:$0xff]  ;;  %v838_v33 = vld [vmem:[#allocation4 + $0x330] sm:$0xff]  ;;  %v841_v34 = vld [vmem:[#allocation4 + $0x348] sm:$0xff] }
 0x111   :  { %v845_v35 = vld [vmem:[#allocation4 + $0x368] sm:$0xff]  ;;  %v843_v36 = vld [vmem:[#allocation4 + $0x358] sm:$0xff] }
 0x112   :  { %v847_v37 = vld [vmem:[#allocation4 + $0x378] sm:$0xff] }
 0x113   :  { %1863 = vmatpush1.bf16.msra.mxu0 %v1862_v51  ;;  %1991 = vmatpush1.bf16.msra.mxu1 %v1990_v52  ;;  %v1882_v51 = vpack.c.bf16 %v804_v41, %v800_v40  ;;  %v2010_v52 = vpack.c.bf16 %v806_v45, %v802_v44  ;;  %v840_v40 = vld [vmem:[#allocation4 + $0x340] sm:$0xff]  ;;  %v842_v44 = vld [vmem:[#allocation4 + $0x350] sm:$0xff] }
 0x114   :  { %1865 = vmatprep.subr.bf16.mxu0 %v1864_v55  ;;  %1993 = vmatprep.subr.bf16.mxu1 %v1992_v56  ;;  %v1884_v55 = vpack.c.bf16 %v813_v47, %v809_v46  ;;  %v2012_v56 = vpack.c.bf16 %v815_v50, %v811_v49  ;;  %v844_v41 = vld [vmem:[#allocation4 + $0x360] sm:$0xff]  ;;  %v846_v45 = vld [vmem:[#allocation4 + $0x370] sm:$0xff]  ;;  %v849_v46 = vld [vmem:[#allocation4 + $0x388] sm:$0xff] }
 0x115   :  { %v853_v47 = vld [vmem:[#allocation4 + $0x3a8] sm:$0xff]  ;;  %v851_v49 = vld [vmem:[#allocation4 + $0x398] sm:$0xff] }
 0x116   :  { %v855_v50 = vld [vmem:[#allocation4 + $0x3b8] sm:$0xff] }
 0x117   :  { %1867 = vmatpush1.bf16.msra.mxu0 %v1866_v63  ;;  %1995 = vmatpush1.bf16.msra.mxu1 %v1994_v0  ;;  %v1886_v63 = vpack.c.bf16 %v812_v54, %v808_v53  ;;  %v2014_v0 = vpack.c.bf16 %v814_v58, %v810_v57  ;;  %v848_v53 = vld [vmem:[#allocation4 + $0x380] sm:$0xff]  ;;  %v1904_v54 = vpack.c.bf16 %v853_v47, %v849_v46  ;;  %v850_v57 = vld [vmem:[#allocation4 + $0x390] sm:$0xff] }
 0x118   :  { %1869 = vmatprep.subr.bf16.mxu0 %v1868_v3  ;;  %1997 = vmatprep.subr.bf16.mxu1 %v1996_v4  ;;  %v1888_v3 = vpack.c.bf16 %v821_v60, %v817_v59  ;;  %v2016_v4 = vpack.c.bf16 %v823_v62, %v819_v61  ;;  %v854_v58 = vld [vmem:[#allocation4 + $0x3b0] sm:$0xff]  ;;  %v857_v61 = vld [vmem:[#allocation4 + $0x3c8] sm:$0xff] }
 0x119   :  { %v2034_v60 = vpack.c.bf16 %v854_v58, %v850_v57  ;;  %v861_v62 = vld [vmem:[#allocation4 + $0x3e8] sm:$0xff] }
 0x11b   :  { %1871 = vmatpush1.bf16.msra.mxu0 %v1870_v12  ;;  %1999 = vmatpush1.bf16.msra.mxu1 %v1998_v15  ;;  %v1890_v12 = vpack.c.bf16 %v820_v2, %v816_v1  ;;  %v2018_v15 = vpack.c.bf16 %v822_v6, %v818_v5  ;;  %v863_v1 = vld [vmem:[#allocation4 + $0x3f8] sm:$0xff]  ;;  %v856_v2 = vld [vmem:[#allocation4 + $0x3c0] sm:$0xff]  ;;  %v858_v6 = vld [vmem:[#allocation4 + $0x3d0] sm:$0xff] }
 0x11c   :  { %1873 = vmatprep.subr.bf16.mxu0 %v1872_v19  ;;  %2001 = vmatprep.subr.bf16.mxu1 %v2000_v20  ;;  %v1892_v19 = vpack.c.bf16 %v829_v8, %v825_v7  ;;  %v2020_v20 = vpack.c.bf16 %v831_v10, %v827_v9  ;;  %v862_v7 = vld [vmem:[#allocation4 + $0x3f0] sm:$0xff]  ;;  %v865_v9 = vld [vmem:[#allocation4 + $0x408] sm:$0xff] }
 0x11d   :  { %v2038_v8 = vpack.c.bf16 %v862_v7, %v858_v6  ;;  %v869_v10 = vld [vmem:[#allocation4 + $0x428] sm:$0xff]  ;;  %v890_v7 = vld [vmem:[#allocation4 + $0x4d0] sm:$0xff] }
 0x11f   :  { %1875 = vmatpush1.bf16.msra.mxu0 %v1874_v27  ;;  %2003 = vmatpush1.bf16.msra.mxu1 %v2002_v28  ;;  %v1894_v27 = vpack.c.bf16 %v828_v18, %v824_v17  ;;  %v2022_v28 = vpack.c.bf16 %v830_v22, %v826_v21  ;;  %v871_v17 = vld [vmem:[#allocation4 + $0x438] sm:$0xff] }
 0x120   :  { %1877 = vmatprep.subr.bf16.mxu0 %v1876_v48  ;;  %2005 = vmatprep.subr.bf16.mxu1 %v2004_v31  ;;  %v1896_v48 = vpack.c.bf16 %v837_v24, %v833_v23  ;;  %v2024_v31 = vpack.c.bf16 %v839_v26, %v835_v25  ;;  %v864_v25 = vld [vmem:[#allocation4 + $0x400] sm:$0xff] }
 0x123   :  { %1879 = vmatpush1.bf16.msra.mxu0 %v1878_v38  ;;  %2007 = vmatpush1.bf16.msra.mxu1 %v2006_v39  ;;  %v1898_v38 = vpack.c.bf16 %v836_v30, %v832_v29  ;;  %v2026_v39 = vpack.c.bf16 %v838_v33, %v834_v32  ;;  %v868_v29 = vld [vmem:[#allocation4 + $0x420] sm:$0xff]  ;;  %v866_v30 = vld [vmem:[#allocation4 + $0x410] sm:$0xff]  ;;  %v873_v32 = vld [vmem:[#allocation4 + $0x448] sm:$0xff] }
 0x124   :  { %1881 = vmatprep.subr.bf16.mxu0 %v1880_v42  ;;  %2009 = vmatprep.subr.bf16.mxu1 %v2008_v43  ;;  %v1900_v42 = vpack.c.bf16 %v845_v35, %v841_v34  ;;  %v2028_v43 = vpack.c.bf16 %v847_v37, %v843_v36  ;;  %v877_v34 = vld [vmem:[#allocation4 + $0x468] sm:$0xff]  ;;  %v875_v35 = vld [vmem:[#allocation4 + $0x458] sm:$0xff] }
 0x125   :  { %v879_v36 = vld [vmem:[#allocation4 + $0x478] sm:$0xff]  ;;  %v1916_v46 = vpack.c.bf16 %v877_v34, %v873_v32  ;;  %v904_v32 = vld [vmem:[#allocation4 + $0x540] sm:$0xff] }
 0x126   :  { %v2044_v47 = vpack.c.bf16 %v879_v36, %v875_v35  ;;  %v906_v36 = vld [vmem:[#allocation4 + $0x550] sm:$0xff] }
 0x127   :  { %1883 = vmatpush1.bf16.msra.mxu0 %v1882_v51  ;;  %2011 = vmatpush1.bf16.msra.mxu1 %v2010_v52  ;;  %v1902_v51 = vpack.c.bf16 %v844_v41, %v840_v40  ;;  %v2030_v52 = vpack.c.bf16 %v846_v45, %v842_v44  ;;  %v872_v40 = vld [vmem:[#allocation4 + $0x440] sm:$0xff]  ;;  %v878_v44 = vld [vmem:[#allocation4 + $0x470] sm:$0xff]  ;;  %v881_v45 = vld [vmem:[#allocation4 + $0x488] sm:$0xff] }
 0x128   :  { %1885 = vmatprep.subr.bf16.mxu0 %v1884_v55  ;;  %2013 = vmatprep.subr.bf16.mxu1 %v2012_v56  ;;  %v2032_v55 = vpack.c.bf16 %v855_v50, %v851_v49  ;;  %v852_v56 = vld [vmem:[#allocation4 + $0x3a0] sm:$0xff]  ;;  %v885_v49 = vld [vmem:[#allocation4 + $0x4a8] sm:$0xff]  ;;  %v883_v50 = vld [vmem:[#allocation4 + $0x498] sm:$0xff] }
 0x129   :  { %v1906_v59 = vpack.c.bf16 %v852_v56, %v848_v53  ;;  %v876_v41 = vld [vmem:[#allocation4 + $0x460] sm:$0xff]  ;;  %v1920_v57 = vpack.c.bf16 %v885_v49, %v881_v45  ;;  %v914_v49 = vld [vmem:[#allocation4 + $0x590] sm:$0xff] }
 0x12a   :  { %v1918_v53 = vpack.c.bf16 %v876_v41, %v872_v40  ;;  %v884_v56 = vld [vmem:[#allocation4 + $0x4a0] sm:$0xff]  ;;  %v915_v40 = vld [vmem:[#allocation4 + $0x598] sm:$0xff] }
 0x12b   :  { %1887 = vmatpush1.bf16.msra.mxu0 %v1886_v63  ;;  %2015 = vmatpush1.bf16.msra.mxu1 %v2014_v0  ;;  %v859_v63 = vld [vmem:[#allocation4 + $0x3d8] sm:$0xff]  ;;  %v1908_v0 = vpack.c.bf16 %v861_v62, %v857_v61  ;;  %v889_v61 = vld [vmem:[#allocation4 + $0x4c8] sm:$0xff]  ;;  %v916_v45 = vld [vmem:[#allocation4 + $0x5a0] sm:$0xff] }
 0x12c   :  { %1889 = vmatprep.subr.bf16.mxu0 %v1888_v3  ;;  %2017 = vmatprep.subr.bf16.mxu1 %v2016_v4  ;;  %v860_v3 = vld [vmem:[#allocation4 + $0x3e0] sm:$0xff]  ;;  %v2036_v4 = vpack.c.bf16 %v863_v1, %v859_v63  ;;  %v893_v62 = vld [vmem:[#allocation4 + $0x4e8] sm:$0xff]  ;;  %v891_v63 = vld [vmem:[#allocation4 + $0x4d8] sm:$0xff] }
 0x12d   :  { %v1910_v5 = vpack.c.bf16 %v860_v3, %v856_v2  ;;  %v888_v3 = vld [vmem:[#allocation4 + $0x4c0] sm:$0xff]  ;;  %v919_v41 = vld [vmem:[#allocation4 + $0x5b8] sm:$0xff] }
 0x12f   :  { %1891 = vmatpush1.bf16.msra.mxu0 %v1890_v12  ;;  %2019 = vmatpush1.bf16.msra.mxu1 %v2018_v15  ;;  %v867_v12 = vld [vmem:[#allocation4 + $0x418] sm:$0xff]  ;;  %v1912_v15 = vpack.c.bf16 %v869_v10, %v865_v9  ;;  %v897_v9 = vld [vmem:[#allocation4 + $0x508] sm:$0xff] }
 0x130   :  { %1893 = vmatprep.subr.bf16.mxu0 %v1892_v19  ;;  %2021 = vmatprep.subr.bf16.mxu1 %v2020_v20  ;;  %v2040_v18 = vpack.c.bf16 %v871_v17, %v867_v12  ;;  %v2405_v19 = vld [vmem:[%s2435_s4] sm:$0xf]  ;;  %v901_v10 = vld [vmem:[#allocation4 + $0x528] sm:$0xff]  ;;  %v899_v12 = vld [vmem:[#allocation4 + $0x518] sm:$0xff] }
 0x131   :  { %v431_v20 = vrot.slane %v2405_v19, %v2375_v13  ;;  %v435_v21 = vrot.slane %v2405_v19, %v2377_v14  ;;  %v443_v22 = vrot.slane %v2405_v19, %v2380_v16 }
 0x133   :  { %1895 = vmatpush1.bf16.msra.mxu0 %v1894_v27  ;;  %2023 = vmatpush1.bf16.msra.mxu1 %v2022_v28 }
 0x134   :  { %1897 = vmatprep.subr.bf16.mxu0 %v1896_v48  ;;  %2025 = vmatprep.subr.bf16.mxu1 %v2024_v31  ;;  %v870_v48 = vld [vmem:[#allocation4 + $0x430] sm:$0xff] }
 0x137   :  { %1899 = vmatpush1.bf16.msra.mxu0 %v1898_v38  ;;  %2027 = vmatpush1.bf16.msra.mxu1 %v2026_v39  ;;  %v1914_v38 = vpack.c.bf16 %v868_v29, %v864_v25  ;;  %v2042_v39 = vpack.c.bf16 %v870_v48, %v866_v30  ;;  %v898_v25 = vld [vmem:[#allocation4 + $0x510] sm:$0xff]  ;;  %v907_v29 = vld [vmem:[#allocation4 + $0x558] sm:$0xff] }
 0x138   :  { %1901 = vmatprep.subr.bf16.mxu0 %v1900_v42  ;;  %2029 = vmatprep.subr.bf16.mxu1 %v2028_v43  ;;  %v874_v43 = vld [vmem:[#allocation4 + $0x450] sm:$0xff]  ;;  %v911_v30 = vld [vmem:[#allocation4 + $0x578] sm:$0xff] }
 0x139   :  { %v2060_v35 = vpack.c.bf16 %v911_v30, %v907_v29  ;;  %v945_v29 = vld [vmem:[#allocation4 + $0x688] sm:$0xff] }
 0x13a   :  { %v949_v30 = vld [vmem:[#allocation4 + $0x6a8] sm:$0xff] }
 0x13b   :  { %1903 = vmatpush1.bf16.msra.mxu0 %v1902_v51  ;;  %2031 = vmatpush1.bf16.msra.mxu1 %v2030_v52  ;;  %v887_v51 = vld [vmem:[#allocation4 + $0x4b8] sm:$0xff] }
 0x13c   :  { %1905 = vmatprep.subr.bf16.mxu0 %v1904_v54  ;;  %2033 = vmatprep.subr.bf16.mxu1 %v2032_v55  ;;  %v2046_v54 = vpack.c.bf16 %v878_v44, %v874_v43  ;;  %v880_v55 = vld [vmem:[#allocation4 + $0x480] sm:$0xff]  ;;  %v2048_v58 = vpack.c.bf16 %v887_v51, %v883_v50  ;;  %v918_v50 = vld [vmem:[#allocation4 + $0x5b0] sm:$0xff]  ;;  %v921_v51 = vld [vmem:[#allocation4 + $0x5c8] sm:$0xff] }
 0x13d   :  { %v1922_v1 = vpack.c.bf16 %v884_v56, %v880_v55  ;;  %v912_v44 = vld [vmem:[#allocation4 + $0x580] sm:$0xff]  ;;  %v2066_v56 = vpack.c.bf16 %v918_v50, %v914_v49 }
 0x13e   :  { %v1938_v55 = vpack.c.bf16 %v916_v45, %v912_v44 }
 0x13f   :  { %1907 = vmatpush1.bf16.msra.mxu0 %v1906_v59  ;;  %2035 = vmatpush1.bf16.msra.mxu1 %v2034_v60  ;;  %v882_v59 = vld [vmem:[#allocation4 + $0x490] sm:$0xff] }
 0x140   :  { %1909 = vmatprep.subr.bf16.mxu0 %v1908_v0  ;;  %2037 = vmatprep.subr.bf16.mxu1 %v2036_v4  ;;  %v886_v60 = vld [vmem:[#allocation4 + $0x4b0] sm:$0xff]  ;;  %v895_v0 = vld [vmem:[#allocation4 + $0x4f8] sm:$0xff]  ;;  %v892_v4 = vld [vmem:[#allocation4 + $0x4e0] sm:$0xff] }
 0x141   :  { %v2050_v2 = vpack.c.bf16 %v886_v60, %v882_v59  ;;  %v2052_v6 = vpack.c.bf16 %v895_v0, %v891_v63  ;;  %v1926_v17 = vpack.c.bf16 %v892_v4, %v888_v3  ;;  %v929_v63 = vld [vmem:[#allocation4 + $0x608] sm:$0xff] }
 0x142   :  { %v933_v0 = vld [vmem:[#allocation4 + $0x628] sm:$0xff] }
 0x143   :  { %1911 = vmatpush1.bf16.msra.mxu0 %v1910_v5  ;;  %2039 = vmatpush1.bf16.msra.mxu1 %v2038_v8  ;;  %v1924_v5 = vpack.c.bf16 %v893_v62, %v889_v61  ;;  %v894_v8 = vld [vmem:[#allocation4 + $0x4f0] sm:$0xff] }
 0x144   :  { %1913 = vmatprep.subr.bf16.mxu0 %v1912_v15  ;;  %2041 = vmatprep.subr.bf16.mxu1 %v2040_v18  ;;  %v903_v15 = vld [vmem:[#allocation4 + $0x538] sm:$0xff]  ;;  %v2054_v18 = vpack.c.bf16 %v894_v8, %v890_v7  ;;  %v922_v61 = vld [vmem:[#allocation4 + $0x5d0] sm:$0xff]  ;;  %v1944_v7 = vpack.c.bf16 %v933_v0, %v929_v63 }
 0x145   :  { %v926_v62 = vld [vmem:[#allocation4 + $0x5f0] sm:$0xff] }
 0x146   :  { %v2070_v4 = vpack.c.bf16 %v926_v62, %v922_v61  ;;  %v962_v63 = vld [vmem:[#allocation4 + $0x710] sm:$0xff] }
 0x147   :  { %v966_v0 = vld [vmem:[#allocation4 + $0x730] sm:$0xff] }
 0x1d9   :  { %v585_v23 = vpop.f32.mrb[0].mxu0  ;;  %v2413_v24 = vpop.f32.mrb[0].mxu1 }
 0x1da   :  { %v2168_v26 = vadd.f32 %v585_v23, %v431_v20  ;;  %v587_v27 = vpop.f32.mrb[1].mxu0  ;;  %v729_v28 = vpop.f32.mrb[1].mxu1  ;;  %v896_v20 = vld [vmem:[#allocation4 + $0x500] sm:$0xff]  ;;  %v2056_v23 = vpack.c.bf16 %v903_v15, %v899_v12  ;;  %v937_v12 = vld [vmem:[#allocation4 + $0x648] sm:$0xff] }
 0x1db   :  { %v2169_v31 = vadd.f32 %v587_v27, %v435_v21  ;;  %v2171_v33 = vadd.f32 %v729_v28, %v443_v22  ;;  %v900_v21 = vld [vmem:[#allocation4 + $0x520] sm:$0xff]  ;;  %v1928_v22 = vpack.c.bf16 %v901_v10, %v897_v9  ;;  %v905_v27 = vld [vmem:[#allocation4 + $0x548] sm:$0xff]  ;;  %v930_v9 = vld [vmem:[#allocation4 + $0x610] sm:$0xff] }
 0x1dc   :  { %v732_v42 = vmax.f32 %v2168_v26, 0.0  ;;  %v902_v26 = vld [vmem:[#allocation4 + $0x530] sm:$0xff]  ;;  %v909_v28 = vld [vmem:[#allocation4 + $0x568] sm:$0xff]  ;;  %v1930_v48 = vpack.c.bf16 %v900_v21, %v896_v20 }
 0x1dd   :  { %v733_v37 = vmax.f32 %v2169_v31, 0.0  ;;  %v735_v52 = vmax.f32 %v2171_v33, 0.0  ;;  %v2058_v31 = vpack.c.bf16 %v902_v26, %v898_v25  ;;  %v908_v33 = vld [vmem:[#allocation4 + $0x560] sm:$0xff]  ;;  %v1932_v34 = vpack.c.bf16 %v909_v28, %v905_v27  ;;  %v934_v10 = vld [vmem:[#allocation4 + $0x630] sm:$0xff]  ;;  %v941_v15 = vld [vmem:[#allocation4 + $0x668] sm:$0xff] }
 0x1de   :  { %v2074_v21 = vpack.c.bf16 %v934_v10, %v930_v9  ;;  %v1948_v25 = vpack.c.bf16 %v941_v15, %v937_v12  ;;  %v938_v27 = vld [vmem:[#allocation4 + $0x650] sm:$0xff] }
 0x1df   :  { %1078 = vmatprep.mubr.f32.mxu0 %v733_v37  ;;  %1220 = vmatprep.mubr.f32.mxu1 %v733_v37  ;;  %v910_v37 = vld [vmem:[#allocation4 + $0x570] sm:$0xff] }
 0x1e0   :  { %1079 = vmatmul.mubr.f32.vlgmr.msra.gmra.mrb[2].mxu0 %v732_v42  ;;  %1221 = vmatmul.mubr.f32.vlgmr.msra.gmra.mrb[2].mxu1 %v732_v42  ;;  %v1934_v42 = vpack.c.bf16 %v908_v33, %v904_v32  ;;  %v2062_v43 = vpack.c.bf16 %v910_v37, %v906_v36  ;;  %v942_v28 = vld [vmem:[#allocation4 + $0x670] sm:$0xff]  ;;  %v1952_v36 = vpack.c.bf16 %v949_v30, %v945_v29 }
 0x1e1   :  { %1915 = vmatpush1.bf16.msra.mxu0 %v1914_v38  ;;  %2043 = vmatpush1.bf16.msra.mxu1 %v2042_v39  ;;  %v913_v38 = vld [vmem:[#allocation4 + $0x588] sm:$0xff]  ;;  %v2078_v33 = vpack.c.bf16 %v942_v28, %v938_v27  ;;  %v970_v12 = vld [vmem:[#allocation4 + $0x750] sm:$0xff] }
 0x1e2   :  { %1149 = vmatprep.mubr.f32.mxu0 %v735_v52  ;;  %1291 = vmatprep.mubr.f32.mxu1 %v735_v52  ;;  %v917_v39 = vld [vmem:[#allocation4 + $0x5a8] sm:$0xff]  ;;  %v974_v15 = vld [vmem:[#allocation4 + $0x770] sm:$0xff] }
 0x1e3   :  { %1917 = vmatprep.subr.bf16.mxu0 %v1916_v46  ;;  %2045 = vmatprep.subr.bf16.mxu1 %v2044_v47  ;;  %v1936_v46 = vpack.c.bf16 %v917_v39, %v913_v38  ;;  %v2064_v47 = vpack.c.bf16 %v919_v41, %v915_v40  ;;  %v925_v52 = vld [vmem:[#allocation4 + $0x5e8] sm:$0xff]  ;;  %v946_v38 = vld [vmem:[#allocation4 + $0x690] sm:$0xff] }
 0x1e4   :  { %v1940_v59 = vpack.c.bf16 %v925_v52, %v921_v51  ;;  %v950_v39 = vld [vmem:[#allocation4 + $0x6b0] sm:$0xff]  ;;  %v953_v40 = vld [vmem:[#allocation4 + $0x6c8] sm:$0xff] }
 0x1e5   :  { %1919 = vmatpush1.bf16.msra.mxu0 %v1918_v53  ;;  %2047 = vmatpush1.bf16.msra.mxu1 %v2046_v54  ;;  %v923_v53 = vld [vmem:[#allocation4 + $0x5d8] sm:$0xff]  ;;  %v957_v41 = vld [vmem:[#allocation4 + $0x6e8] sm:$0xff]  ;;  %v2082_v45 = vpack.c.bf16 %v950_v39, %v946_v38  ;;  %v954_v51 = vld [vmem:[#allocation4 + $0x6d0] sm:$0xff]  ;;  %v439_v38 = vrot.slane %v2405_v19, %v2370_v11 }
 0x1e6   :  { %1921 = vmatprep.subr.bf16.mxu0 %v1920_v57  ;;  %2049 = vmatprep.subr.bf16.mxu1 %v2048_v58  ;;  %v927_v54 = vld [vmem:[#allocation4 + $0x5f8] sm:$0xff]  ;;  %v920_v57 = vld [vmem:[#allocation4 + $0x5c0] sm:$0xff]  ;;  %v1956_v49 = vpack.c.bf16 %v957_v41, %v953_v40  ;;  %v958_v52 = vld [vmem:[#allocation4 + $0x6f0] sm:$0xff] }
 0x1e7   :  { %v924_v58 = vld [vmem:[#allocation4 + $0x5e0] sm:$0xff]  ;;  %v2068_v60 = vpack.c.bf16 %v927_v54, %v923_v53  ;;  %v961_v53 = vld [vmem:[#allocation4 + $0x708] sm:$0xff]  ;;  %v978_v29 = vld [vmem:[#allocation4 + $0x790] sm:$0xff] }
 0x1e8   :  { %v1942_v3 = vpack.c.bf16 %v924_v58, %v920_v57  ;;  %v965_v54 = vld [vmem:[#allocation4 + $0x728] sm:$0xff]  ;;  %v2086_v58 = vpack.c.bf16 %v958_v52, %v954_v51  ;;  %v982_v30 = vld [vmem:[#allocation4 + $0x7b0] sm:$0xff]  ;;  %v2170_v52 = vadd.f32 %v2413_v24, %v439_v38 }
 0x1e9   :  { %1923 = vmatpush1.bf16.msra.mxu0 %v1922_v1  ;;  %2051 = vmatpush1.bf16.msra.mxu1 %v2050_v2  ;;  %v931_v1 = vld [vmem:[#allocation4 + $0x618] sm:$0xff]  ;;  %v1960_v61 = vpack.c.bf16 %v965_v54, %v961_v53  ;;  %v986_v41 = vld [vmem:[#allocation4 + $0x7d0] sm:$0xff]  ;;  %v1303_v51 = vld [vmem:[#allocation6 + $0x8] sm:$0xff] }
 0x1ea   :  { %1925 = vmatprep.subr.bf16.mxu0 %v1924_v5  ;;  %2053 = vmatprep.subr.bf16.mxu1 %v2052_v6  ;;  %v935_v2 = vld [vmem:[#allocation4 + $0x638] sm:$0xff]  ;;  %v928_v5 = vld [vmem:[#allocation4 + $0x600] sm:$0xff] }
 0x1eb   :  { %v932_v6 = vld [vmem:[#allocation4 + $0x620] sm:$0xff]  ;;  %v2072_v8 = vpack.c.bf16 %v935_v2, %v931_v1  ;;  %v969_v1 = vld [vmem:[#allocation4 + $0x748] sm:$0xff] }
 0x1ec   :  { %v1946_v20 = vpack.c.bf16 %v932_v6, %v928_v5  ;;  %v973_v2 = vld [vmem:[#allocation4 + $0x768] sm:$0xff]  ;;  %v2090_v6 = vpack.c.bf16 %v966_v0, %v962_v63  ;;  %v1334_v54 = vld [vmem:[#allocation6 + $0x100] sm:$0xff]  ;;  %v1305_v63 = vld [vmem:[#allocation6 + $0x18] sm:$0xff]  ;;  %v734_v0 = vmax.f32 %v2170_v52, 0.0 }
 0x1ed   :  { %1927 = vmatpush1.bf16.msra.mxu0 %v1926_v17  ;;  %2055 = vmatpush1.bf16.msra.mxu1 %v2054_v18  ;;  %v939_v17 = vld [vmem:[#allocation4 + $0x658] sm:$0xff]  ;;  %v1964_v9 = vpack.c.bf16 %v973_v2, %v969_v1  ;;  %v1336_v2 = vld [vmem:[#allocation6 + $0x110] sm:$0xff] }
 0x1ee   :  { %1929 = vmatprep.subr.bf16.mxu0 %v1928_v22  ;;  %2057 = vmatprep.subr.bf16.mxu1 %v2056_v23  ;;  %v943_v18 = vld [vmem:[#allocation4 + $0x678] sm:$0xff]  ;;  %v936_v22 = vld [vmem:[#allocation4 + $0x640] sm:$0xff]  ;;  %v1312_v52 = vld [vmem:[#allocation6 + $0x50] sm:$0xff] }
 0x1ef   :  { %v940_v23 = vld [vmem:[#allocation4 + $0x660] sm:$0xff]  ;;  %v2076_v26 = vpack.c.bf16 %v943_v18, %v939_v17  ;;  %v977_v17 = vld [vmem:[#allocation4 + $0x788] sm:$0xff] }
 0x1f0   :  { %v1950_v32 = vpack.c.bf16 %v940_v23, %v936_v22  ;;  %v981_v18 = vld [vmem:[#allocation4 + $0x7a8] sm:$0xff]  ;;  %v2094_v23 = vpack.c.bf16 %v974_v15, %v970_v12 }
 0x1f1   :  { %1931 = vmatpush1.bf16.msra.mxu0 %v1930_v48  ;;  %2059 = vmatpush1.bf16.msra.mxu1 %v2058_v31  ;;  %v947_v48 = vld [vmem:[#allocation4 + $0x698] sm:$0xff]  ;;  %v1968_v27 = vpack.c.bf16 %v981_v18, %v977_v17  ;;  %v1307_v12 = vld [vmem:[#allocation6 + $0x28] sm:$0xff]  ;;  %v1338_v18 = vld [vmem:[#allocation6 + $0x120] sm:$0xff] }
 0x1f2   :  { %1933 = vmatprep.subr.bf16.mxu0 %v1932_v34  ;;  %2061 = vmatprep.subr.bf16.mxu1 %v2060_v35  ;;  %v951_v31 = vld [vmem:[#allocation4 + $0x6b8] sm:$0xff]  ;;  %v944_v34 = vld [vmem:[#allocation4 + $0x680] sm:$0xff] }
 0x1f3   :  { %v948_v35 = vld [vmem:[#allocation4 + $0x6a0] sm:$0xff]  ;;  %v2080_v37 = vpack.c.bf16 %v951_v31, %v947_v48  ;;  %v985_v48 = vld [vmem:[#allocation4 + $0x7c8] sm:$0xff] }
 0x1f4   :  { %v1954_v44 = vpack.c.bf16 %v948_v35, %v944_v34  ;;  %v989_v31 = vld [vmem:[#allocation4 + $0x7e8] sm:$0xff]  ;;  %v2098_v35 = vpack.c.bf16 %v982_v30, %v978_v29  ;;  %v1309_v29 = vld [vmem:[#allocation6 + $0x38] sm:$0xff] }
 0x1f5   :  { %1935 = vmatpush1.bf16.msra.mxu0 %v1934_v42  ;;  %2063 = vmatpush1.bf16.msra.mxu1 %v2062_v43  ;;  %v955_v42 = vld [vmem:[#allocation4 + $0x6d8] sm:$0xff]  ;;  %v1972_v39 = vpack.c.bf16 %v989_v31, %v985_v48  ;;  %v1340_v31 = vld [vmem:[#allocation6 + $0x130] sm:$0xff] }
 0x1f6   :  { %1937 = vmatprep.subr.bf16.mxu0 %v1936_v46  ;;  %2065 = vmatprep.subr.bf16.mxu1 %v2064_v47  ;;  %v959_v43 = vld [vmem:[#allocation4 + $0x6f8] sm:$0xff]  ;;  %v952_v46 = vld [vmem:[#allocation4 + $0x6c0] sm:$0xff] }
 0x1f7   :  { %v956_v47 = vld [vmem:[#allocation4 + $0x6e0] sm:$0xff]  ;;  %v2084_v50 = vpack.c.bf16 %v959_v43, %v955_v42  ;;  %v990_v42 = vld [vmem:[#allocation4 + $0x7f0] sm:$0xff] }
 0x1f8   :  { %v1958_v57 = vpack.c.bf16 %v956_v47, %v952_v46  ;;  %v1318_v43 = vld [vmem:[#allocation6 + $0x80] sm:$0xff]  ;;  %v1351_v46 = vld [vmem:[#allocation6 + $0x188] sm:$0xff] }
 0x1f9   :  { %1939 = vmatpush1.bf16.msra.mxu0 %v1938_v55  ;;  %2067 = vmatpush1.bf16.msra.mxu1 %v2066_v56  ;;  %v963_v55 = vld [vmem:[#allocation4 + $0x718] sm:$0xff] }
 0x1fa   :  { %1941 = vmatprep.subr.bf16.mxu0 %v1940_v59  ;;  %2069 = vmatprep.subr.bf16.mxu1 %v2068_v60  ;;  %v967_v56 = vld [vmem:[#allocation4 + $0x738] sm:$0xff]  ;;  %v960_v59 = vld [vmem:[#allocation4 + $0x700] sm:$0xff] }
 0x1fb   :  { %v964_v60 = vld [vmem:[#allocation4 + $0x720] sm:$0xff]  ;;  %v2088_v62 = vpack.c.bf16 %v967_v56, %v963_v55  ;;  %v1335_v55 = vld [vmem:[#allocation6 + $0x108] sm:$0xff]  ;;  %v1320_v56 = vld [vmem:[#allocation6 + $0x90] sm:$0xff] }
 0x1fc   :  { %v1962_v5 = vpack.c.bf16 %v964_v60, %v960_v59  ;;  %v1353_v59 = vld [vmem:[#allocation6 + $0x198] sm:$0xff] }
 0x1fd   :  { %1943 = vmatpush1.bf16.msra.mxu0 %v1942_v3  ;;  %2071 = vmatpush1.bf16.msra.mxu1 %v2070_v4  ;;  %v971_v3 = vld [vmem:[#allocation4 + $0x758] sm:$0xff] }
 0x1fe   :  { %1945 = vmatprep.subr.bf16.mxu0 %v1944_v7  ;;  %2073 = vmatprep.subr.bf16.mxu1 %v2072_v8  ;;  %v975_v4 = vld [vmem:[#allocation4 + $0x778] sm:$0xff]  ;;  %v968_v7 = vld [vmem:[#allocation4 + $0x740] sm:$0xff] }
 0x1ff   :  { %v972_v8 = vld [vmem:[#allocation4 + $0x760] sm:$0xff]  ;;  %v2092_v10 = vpack.c.bf16 %v975_v4, %v971_v3  ;;  %v1337_v3 = vld [vmem:[#allocation6 + $0x118] sm:$0xff] }
 0x200   :  { %v1966_v22 = vpack.c.bf16 %v972_v8, %v968_v7  ;;  %v1322_v4 = vld [vmem:[#allocation6 + $0xa0] sm:$0xff]  ;;  %v1355_v7 = vld [vmem:[#allocation6 + $0x1a8] sm:$0xff] }
 0x201   :  { %1947 = vmatpush1.bf16.msra.mxu0 %v1946_v20  ;;  %2075 = vmatpush1.bf16.msra.mxu1 %v2074_v21  ;;  %v979_v20 = vld [vmem:[#allocation4 + $0x798] sm:$0xff] }
 0x202   :  { %1949 = vmatprep.subr.bf16.mxu0 %v1948_v25  ;;  %2077 = vmatprep.subr.bf16.mxu1 %v2076_v26  ;;  %v983_v21 = vld [vmem:[#allocation4 + $0x7b8] sm:$0xff]  ;;  %v976_v25 = vld [vmem:[#allocation4 + $0x780] sm:$0xff] }
 0x203   :  { %v980_v26 = vld [vmem:[#allocation4 + $0x7a0] sm:$0xff]  ;;  %v2096_v28 = vpack.c.bf16 %v983_v21, %v979_v20  ;;  %v1339_v20 = vld [vmem:[#allocation6 + $0x128] sm:$0xff]  ;;  %v1324_v21 = vld [vmem:[#allocation6 + $0xb0] sm:$0xff] }
 0x204   :  { %v1970_v34 = vpack.c.bf16 %v980_v26, %v976_v25  ;;  %v1357_v25 = vld [vmem:[#allocation6 + $0x1b8] sm:$0xff] }
 0x205   :  { %1951 = vmatpush1.bf16.msra.mxu0 %v1950_v32  ;;  %2079 = vmatpush1.bf16.msra.mxu1 %v2078_v33  ;;  %v987_v32 = vld [vmem:[#allocation4 + $0x7d8] sm:$0xff] }
 0x206   :  { %1953 = vmatprep.subr.bf16.mxu0 %v1952_v36  ;;  %2081 = vmatprep.subr.bf16.mxu1 %v2080_v37  ;;  %v991_v33 = vld [vmem:[#allocation4 + $0x7f8] sm:$0xff]  ;;  %v984_v36 = vld [vmem:[#allocation4 + $0x7c0] sm:$0xff] }
 0x207   :  { %v988_v37 = vld [vmem:[#allocation4 + $0x7e0] sm:$0xff]  ;;  %v2100_v40 = vpack.c.bf16 %v991_v33, %v987_v32  ;;  %v1341_v32 = vld [vmem:[#allocation6 + $0x138] sm:$0xff] }
 0x208   :  { %v1974_v47 = vpack.c.bf16 %v988_v37, %v984_v36  ;;  %v1326_v33 = vld [vmem:[#allocation6 + $0xc0] sm:$0xff]  ;;  %v1359_v36 = vld [vmem:[#allocation6 + $0x1c8] sm:$0xff]  ;;  %v2150_v38 = vpack.c.bf16 %v1341_v32, %v1340_v31 }
 0x209   :  { %1955 = vmatpush1.bf16.msra.mxu0 %v1954_v44  ;;  %2083 = vmatpush1.bf16.msra.mxu1 %v2082_v45  ;;  %v1319_v44 = vld [vmem:[#allocation6 + $0x88] sm:$0xff]  ;;  %v1350_v45 = vld [vmem:[#allocation6 + $0x180] sm:$0xff] }
 0x20a   :  { %1957 = vmatprep.subr.bf16.mxu0 %v1956_v49  ;;  %2085 = vmatprep.subr.bf16.mxu1 %v2084_v50  ;;  %v2102_v49 = vpack.c.bf16 %v990_v42, %v986_v41  ;;  %v1302_v50 = vld [vmem:[#allocation6] sm:$0xff]  ;;  %v2104_v19 = vpack.c.bf16 %v1319_v44, %v1318_v43  ;;  %v2136_v53 = vpack.c.bf16 %v1351_v46, %v1350_v45  ;;  %v1343_v44 = vld [vmem:[#allocation6 + $0x148] sm:$0xff]  ;;  %v1328_v45 = vld [vmem:[#allocation6 + $0xd0] sm:$0xff] }
 0x20b   :  { %v2106_v60 = vpack.c.bf16 %v1303_v51, %v1302_v50  ;;  %v1342_v43 = vld [vmem:[#allocation6 + $0x140] sm:$0xff]  ;;  %v1329_v46 = vld [vmem:[#allocation6 + $0xd8] sm:$0xff] }
 0x20c   :  { %v2154_v51 = vpack.c.bf16 %v1343_v44, %v1342_v43 }
 0x20d   :  { %1959 = vmatpush1.bf16.msra.mxu0 %v1958_v57  ;;  %2087 = vmatpush1.bf16.msra.mxu1 %v2086_v58  ;;  %v1321_v57 = vld [vmem:[#allocation6 + $0x98] sm:$0xff]  ;;  %v1352_v58 = vld [vmem:[#allocation6 + $0x190] sm:$0xff] }
 0x20e   :  { %1961 = vmatprep.subr.bf16.mxu0 %v1960_v61  ;;  %2089 = vmatprep.subr.bf16.mxu1 %v2088_v62  ;;  %v2138_v61 = vpack.c.bf16 %v1335_v55, %v1334_v54  ;;  %v1304_v62 = vld [vmem:[#allocation6 + $0x10] sm:$0xff]  ;;  %v2108_v24 = vpack.c.bf16 %v1321_v57, %v1320_v56  ;;  %v2140_v1 = vpack.c.bf16 %v1353_v59, %v1352_v58  ;;  %v1345_v56 = vld [vmem:[#allocation6 + $0x158] sm:$0xff]  ;;  %v1330_v57 = vld [vmem:[#allocation6 + $0xe0] sm:$0xff] }
 0x20f   :  { %v2110_v8 = vpack.c.bf16 %v1305_v63, %v1304_v62  ;;  %v1344_v55 = vld [vmem:[#allocation6 + $0x150] sm:$0xff]  ;;  %v1331_v58 = vld [vmem:[#allocation6 + $0xe8] sm:$0xff]  ;;  %v1362_v59 = vld [vmem:[#allocation6 + $0x1e0] sm:$0xff] }
 0x210   :  { %v2158_v62 = vpack.c.bf16 %v1345_v56, %v1344_v55  ;;  %v2128_v63 = vpack.c.bf16 %v1331_v58, %v1330_v57 }
 0x211   :  { %1963 = vmatpush1.bf16.msra.mxu0 %v1962_v5  ;;  %2091 = vmatpush1.bf16.msra.mxu1 %v2090_v6  ;;  %v1323_v5 = vld [vmem:[#allocation6 + $0xa8] sm:$0xff]  ;;  %v1354_v6 = vld [vmem:[#allocation6 + $0x1a0] sm:$0xff] }
 0x212   :  { %1965 = vmatprep.subr.bf16.mxu0 %v1964_v9  ;;  %2093 = vmatprep.subr.bf16.mxu1 %v2092_v10  ;;  %v2142_v9 = vpack.c.bf16 %v1337_v3, %v1336_v2  ;;  %v1306_v10 = vld [vmem:[#allocation6 + $0x20] sm:$0xff]  ;;  %v2112_v15 = vpack.c.bf16 %v1323_v5, %v1322_v4  ;;  %v2144_v17 = vpack.c.bf16 %v1355_v7, %v1354_v6  ;;  %v1347_v4 = vld [vmem:[#allocation6 + $0x168] sm:$0xff]  ;;  %v1332_v6 = vld [vmem:[#allocation6 + $0xf0] sm:$0xff] }
 0x213   :  { %v2114_v26 = vpack.c.bf16 %v1307_v12, %v1306_v10  ;;  %v1346_v2 = vld [vmem:[#allocation6 + $0x160] sm:$0xff]  ;;  %v1333_v7 = vld [vmem:[#allocation6 + $0xf8] sm:$0xff]  ;;  %v1316_v12 = vld [vmem:[#allocation6 + $0x70] sm:$0xff] }
 0x214   :  { %v2162_v5 = vpack.c.bf16 %v1347_v4, %v1346_v2  ;;  %v1365_v10 = vld [vmem:[#allocation6 + $0x1f8] sm:$0xff] }
 0x215   :  { %1967 = vmatpush1.bf16.msra.mxu0 %v1966_v22  ;;  %2095 = vmatpush1.bf16.msra.mxu1 %v2094_v23  ;;  %v1325_v22 = vld [vmem:[#allocation6 + $0xb8] sm:$0xff]  ;;  %v1356_v23 = vld [vmem:[#allocation6 + $0x1b0] sm:$0xff] }
 0x216   :  { %1969 = vmatprep.subr.bf16.mxu0 %v1968_v27  ;;  %2097 = vmatprep.subr.bf16.mxu1 %v2096_v28  ;;  %v2146_v27 = vpack.c.bf16 %v1339_v20, %v1338_v18  ;;  %v1308_v28 = vld [vmem:[#allocation6 + $0x30] sm:$0xff]  ;;  %v2116_v30 = vpack.c.bf16 %v1325_v22, %v1324_v21  ;;  %v2148_v48 = vpack.c.bf16 %v1357_v25, %v1356_v23  ;;  %v1349_v21 = vld [vmem:[#allocation6 + $0x178] sm:$0xff] }
 0x217   :  { %v2118_v37 = vpack.c.bf16 %v1309_v29, %v1308_v28  ;;  %v1348_v20 = vld [vmem:[#allocation6 + $0x170] sm:$0xff] }
 0x218   :  { %v2166_v22 = vpack.c.bf16 %v1349_v21, %v1348_v20  ;;  %v992_v23 = vld [vmem:[%s2437_s6] sm:$0xf] }
 0x219   :  { %1971 = vmatpush1.bf16.msra.mxu0 %v1970_v34  ;;  %2099 = vmatpush1.bf16.msra.mxu1 %v2098_v35  ;;  %v1327_v34 = vld [vmem:[#allocation6 + $0xc8] sm:$0xff]  ;;  %v1358_v35 = vld [vmem:[#allocation6 + $0x1c0] sm:$0xff]  ;;  %v997_v25 = vrot.slane %v992_v23, %v2375_v13  ;;  %v1009_v28 = vrot.slane %v992_v23, %v2380_v16 }
 0x21a   :  { %1973 = vmatprep.subr.bf16.mxu0 %v1972_v39  ;;  %2101 = vmatprep.subr.bf16.mxu1 %v2100_v40  ;;  %v1310_v39 = vld [vmem:[#allocation6 + $0x40] sm:$0xff]  ;;  %v1311_v40 = vld [vmem:[#allocation6 + $0x48] sm:$0xff]  ;;  %v2120_v41 = vpack.c.bf16 %v1327_v34, %v1326_v33  ;;  %v2152_v42 = vpack.c.bf16 %v1359_v36, %v1358_v35 }
 0x21b   :  { %v2122_v50 = vpack.c.bf16 %v1311_v40, %v1310_v39 }
 0x21d   :  { %1975 = vmatpush1.bf16.msra.mxu0 %v1974_v47  ;;  %2103 = vmatpush1.bf16.msra.mxu1 %v2102_v49  ;;  %v1360_v47 = vld [vmem:[#allocation6 + $0x1d0] sm:$0xff]  ;;  %v1361_v49 = vld [vmem:[#allocation6 + $0x1d8] sm:$0xff] }
 0x21e   :  { %2105 = vmatprep.subr.bf16.mxu0 %v2104_v19  ;;  %2137 = vmatprep.subr.bf16.mxu1 %v2136_v53  ;;  %v1313_v19 = vld [vmem:[#allocation6 + $0x58] sm:$0xff]  ;;  %v2124_v53 = vpack.c.bf16 %v1329_v46, %v1328_v45  ;;  %v2156_v54 = vpack.c.bf16 %v1361_v49, %v1360_v47 }
 0x220   :  { %1150 = vmatmul.mubr.f32.vlgmr.msra.gmra.mrb[2].mxu0 %v734_v0  ;;  %1292 = vmatmul.mubr.f32.vlgmr.msra.gmra.mrb[2].mxu1 %v734_v0 }
 0x221   :  { %2107 = vmatpush3.bf16.msra.mxu0 %v2106_v60  ;;  %2139 = vmatpush3.bf16.msra.mxu1 %v2138_v61  ;;  %v1363_v60 = vld [vmem:[#allocation6 + $0x1e8] sm:$0xff]  ;;  %v2126_v61 = vpack.c.bf16 %v1313_v19, %v1312_v52 }
 0x222   :  { %2109 = vmatprep.subr.bf16.mxu0 %v2108_v24  ;;  %2141 = vmatprep.subr.bf16.mxu1 %v2140_v1  ;;  %v2160_v0 = vpack.c.bf16 %v1363_v60, %v1362_v59  ;;  %v1314_v24 = vld [vmem:[#allocation6 + $0x60] sm:$0xff]  ;;  %v1315_v1 = vld [vmem:[#allocation6 + $0x68] sm:$0xff] }
 0x223   :  { %v2130_v3 = vpack.c.bf16 %v1315_v1, %v1314_v24 }
 0x225   :  { %2111 = vmatpush3.bf16.msra.mxu0 %v2110_v8  ;;  %2143 = vmatpush3.bf16.msra.mxu1 %v2142_v9  ;;  %v1364_v8 = vld [vmem:[#allocation6 + $0x1f0] sm:$0xff]  ;;  %v2132_v9 = vpack.c.bf16 %v1333_v7, %v1332_v6 }
 0x226   :  { %2113 = vmatprep.subr.bf16.mxu0 %v2112_v15  ;;  %2145 = vmatprep.subr.bf16.mxu1 %v2144_v17  ;;  %v1317_v15 = vld [vmem:[#allocation6 + $0x78] sm:$0xff]  ;;  %v2164_v17 = vpack.c.bf16 %v1365_v10, %v1364_v8 }
 0x227   :  { %v2134_v18 = vpack.c.bf16 %v1317_v15, %v1316_v12 }
 0x229   :  { %2115 = vmatpush3.bf16.msra.mxu0 %v2114_v26  ;;  %2147 = vmatpush3.bf16.msra.mxu1 %v2146_v27  ;;  %v1005_v26 = vrot.slane %v992_v23, %v2370_v11  ;;  %v1001_v27 = vrot.slane %v992_v23, %v2377_v14  ;;  %v1521_v14 = vld [vmem:[%s2439_s8] ss:$0 sm:$0xff] }
 0x22a   :  { %2117 = vmatprep.subr.bf16.mxu0 %v2116_v30  ;;  %2149 = vmatprep.subr.bf16.mxu1 %v2148_v48 }
 0x22d   :  { %2119 = vmatpush3.bf16.msra.mxu0 %v2118_v37  ;;  %2151 = vmatpush3.bf16.msra.mxu1 %v2150_v38 }
 0x22e   :  { %2121 = vmatprep.subr.bf16.mxu0 %v2120_v41  ;;  %2153 = vmatprep.subr.bf16.mxu1 %v2152_v42 }
 0x231   :  { %2123 = vmatpush3.bf16.msra.mxu0 %v2122_v50  ;;  %2155 = vmatpush3.bf16.msra.mxu1 %v2154_v51 }
 0x232   :  { %2125 = vmatprep.subr.bf16.mxu0 %v2124_v53  ;;  %2157 = vmatprep.subr.bf16.mxu1 %v2156_v54 }
 0x235   :  { %2127 = vmatpush3.bf16.msra.mxu0 %v2126_v61  ;;  %2159 = vmatpush3.bf16.msra.mxu1 %v2158_v62 }
 0x236   :  { %2129 = vmatprep.subr.bf16.mxu0 %v2128_v63  ;;  %2161 = vmatprep.subr.bf16.mxu1 %v2160_v0 }
 0x239   :  { %2131 = vmatpush3.bf16.msra.mxu0 %v2130_v3  ;;  %2163 = vmatpush3.bf16.msra.mxu1 %v2162_v5 }
 0x23a   :  { %2133 = vmatprep.subr.bf16.mxu0 %v2132_v9  ;;  %2165 = vmatprep.subr.bf16.mxu1 %v2164_v17 }
 0x23d   :  { %2135 = vmatpush3.bf16.msra.mxu0 %v2134_v18  ;;  %2167 = vmatpush3.bf16.msra.mxu1 %v2166_v22 }
 0x2f3   :  { %v1151_v29 = vpop.f32.mrb[2].mxu0  ;;  %v1293_v30 = vpop.f32.mrb[2].mxu1 }
 0x2f4   :  { %v2172_v48 = vadd.f32 %v1151_v29, %v997_v25  ;;  %v2174_v31 = vadd.f32 %v1293_v30, %v1005_v26  ;;  %v1153_v32 = vpop.f32.mrb[3].mxu0  ;;  %v1295_v33 = vpop.f32.mrb[3].mxu1 }
 0x2f5   :  { %v2173_v34 = vadd.f32 %v1153_v32, %v1001_v27  ;;  %v2175_v35 = vadd.f32 %v1295_v33, %v1009_v28 }
 0x2f6   :  { %v1298_v38 = vmax.f32 %v2172_v48, 0.0  ;;  %v1300_v39 = vmax.f32 %v2174_v31, 0.0 }
 0x2f7   :  { %v1299_v36 = vmax.f32 %v2173_v34, 0.0  ;;  %v1301_v37 = vmax.f32 %v2175_v35, 0.0 }
 0x2f9   :  { %1437 = vmatprep.mubr.f32.mxu0 %v1299_v36  ;;  %1507 = vmatprep.mubr.f32.mxu1 %v1301_v37 }
 0x2fa   :  { %1438 = vmatmul.mubr.f32.vlgmr.msra.gmra.mrb[4].mxu0 %v1298_v38  ;;  %1508 = vmatmul.mubr.f32.vlgmr.msra.gmra.mrb[4].mxu1 %v1300_v39 }
 0x3cd   :  { %v1554_v11 = vpop.f32.mrb[4].mxu0  ;;  %v1589_v13 = vpop.f32.mrb[4].mxu1 }
 0x3ce   :  { %v1555_v16 = vpop.f32.mrb[5].mxu0  ;;  %v1590_v40 = vpop.f32.mrb[5].mxu1 }
 0x3cf   :  { %v1556_v41 = vadd.f32 %v1555_v16, %v1554_v11  ;;  %v1591_v42 = vadd.f32 %v1590_v40, %v1589_v13 }
 0x3d1   :  { %v1440_v43 = vadd.f32 %v1556_v41, %v1521_v14 }
 0x3d3   :  { %v1510_v44 = vadd.f32 %v1591_v42, %v1440_v43 }
 0x3d5   :  { %1513 = vst [vmem:[%s2440_s9] sm:$0xff] %v1510_v44 }
 0x3d6   :  { %1518 = vsyncpa [#allocation3], 1 }
 0x3d7   :  { %1519 = vsyncpa [#allocation5], 1 }

</bundles_post_ra>
